<compile_context>
chip_gen: v6e
topology: v6e:2x2x1
jax: 0.10.0
libtpu: 0.0.40
codegen_flags: <defaults>
</compile_context>

<pallas_src>
import jax
import jax.numpy as jnp
from jax import lax
from jax.experimental import pallas as pl
from jax.experimental.pallas import tpu as pltpu


# ----------------------------------------------------------------------------
# Fused Pallas kernel: conv1+ReLU -> conv2+ReLU -> conv3+ReLU -> FC
# (each conv pre-lowered to a dense GEMM; see prepare_dense_params below)
# ----------------------------------------------------------------------------
def _fused_cnn_encoder_kernel(x_ref,
                              w0_ref, b0_ref,
                              w1_ref, b1_ref,
                              w2_ref, b2_ref,
                              wf_ref, bf_ref,
                              o_ref):
    # All operands / intermediates are VMEM/vreg-resident.  Weights are bf16
    # (native MXU input); activations are cast to bf16 just before each dot;
    # accumulation is f32 via preferred_element_type; bias add in f32.
    h = x_ref[...].astype(jnp.bfloat16)                                  # (B, 1024)
    h = jnp.maximum(
        jnp.dot(h, w0_ref[...],
                preferred_element_type=jnp.float32) + b0_ref[...], 0.0)  # (B, 512)
    h = jnp.maximum(
        jnp.dot(h.astype(jnp.bfloat16), w1_ref[...],
                preferred_element_type=jnp.float32) + b1_ref[...], 0.0)  # (B, 256)
    h = jnp.maximum(
        jnp.dot(h.astype(jnp.bfloat16), w2_ref[...],
                preferred_element_type=jnp.float32) + b2_ref[...], 0.0)  # (B, 128)
    z = jnp.dot(h.astype(jnp.bfloat16), wf_ref[...],
                preferred_element_type=jnp.float32) + bf_ref[...]        # (B, Npad)
    o_ref[...] = z.astype(o_ref.dtype)


def cnn_encoder_forward(x_nchw, dense_params, *, latent_dim):
    """Fused Encoder('cnn') forward: a single gridless pallas_call."""
    (w0, b0), (w1, b1), (w2, b2), (wf, bf) = dense_params
    B = x_nchw.shape[0]
    n_pad = wf.shape[1]
    # NCHW flatten is a pure view; w0's rows were ordered to consume it
    # directly, so no NCHW<->NHWC transpose ever runs at forward time.
    x_flat = x_nchw.reshape(B, -1).astype(jnp.float32)

    operands = (x_flat, w0, b0, w1, b1, w2, b2, wf, bf)

    # Gridless call: every operand / the output is one full-array VMEM block.
    # No pipelining machinery, no double-buffering of the ~1.4 MB of weights.
    vmem = pltpu.MemorySpace.VMEM
    in_specs = [pl.BlockSpec(memory_space=vmem) for _ in operands]

    flops = 2 * B * (w0.shape[0] * w0.shape[1] + w1.shape[0] * w1.shape[1]
                     + w2.shape[0] * w2.shape[1] + wf.shape[0] * wf.shape[1])
    bytes_accessed = (sum(int(a.size) * a.dtype.itemsize for a in operands)
                      + B * n_pad * 4)

    z_pad = pl.pallas_call(
        _fused_cnn_encoder_kernel,
        out_shape=jax.ShapeDtypeStruct((B, n_pad), jnp.float32),
        in_specs=in_specs,
        out_specs=pl.BlockSpec(memory_space=vmem),
        cost_estimate=pl.CostEstimate(flops=flops, transcendentals=0,
                                      bytes_accessed=bytes_accessed),
        compiler_params=pltpu.CompilerParams(
            vmem_limit_bytes=32 * 1024 * 1024,   # fits v5e/v6e/v7x scoped VMEM
        ),
    )(*operands)
    return z_pad[:, :latent_dim]


# ----------------------------------------------------------------------------
# One-time parameter preparation (host / init time, NOT in the forward path)
# ----------------------------------------------------------------------------
def _unfold_conv_to_dense(w_oihw, bias, input_hw, stride, padding, input_layout):
    """Lower Conv2d(OIHW, stride, padding) on an (H, W) image to a dense GEMM.

    Returns (w_mat, b_row, (Ho, Wo)) such that
        out_flat_nhwc = in_flat @ w_mat + b_row
    where in_flat is the image flattened in `input_layout` order ('nchw' for
    the module input, 'nhwc' for internal activations) and out_flat_nhwc is
    flattened as (ho, wo, cout).  Spatial zero-padding is folded into w_mat.
    Built by pushing an identity basis through lax.conv -> correct by
    construction.
    """
    cout, cin, _, _ = w_oihw.shape
    h, w = input_hw
    in_dim = cin * h * w
    eye = jnp.eye(in_dim, dtype=jnp.float32)
    if input_layout == "nchw":
        basis = eye.reshape(in_dim, cin, h, w)
    elif input_layout == "nhwc":
        basis = eye.reshape(in_dim, h, w, cin).transpose(0, 3, 1, 2)
    else:
        raise ValueError(input_layout)
    resp = lax.conv_general_dilated(
        basis, w_oihw.astype(jnp.float32),
        window_strides=(stride, stride),
        padding=((padding, padding), (padding, padding)),
        dimension_numbers=("NCHW", "OIHW", "NCHW"),
    )                                               # (in_dim, Cout, Ho, Wo)
    ho, wo = resp.shape[2], resp.shape[3]
    w_mat = resp.transpose(0, 2, 3, 1).reshape(in_dim, ho * wo * cout)
    b_row = jnp.tile(bias.astype(jnp.float32), ho * wo).reshape(1, ho * wo * cout)
    return w_mat, b_row, (ho, wo)


def prepare_dense_params(conv_params, fc_w, fc_b, image_hw, stride=2, padding=1,
                         lane_multiple=128):
    """Unfold convs to dense GEMMs (bf16), reorder + lane-pad the FC. Runs once."""
    dense = []
    h, w = image_hw
    layout = "nchw"          # raw module input arrives NCHW
    c_last = None
    for (wgt, bias) in conv_params:
        w_mat, b_row, (h, w) = _unfold_conv_to_dense(
            wgt, bias, (h, w), stride, padding, layout)
        dense.append((w_mat.astype(jnp.bfloat16), b_row.astype(jnp.float32)))
        layout = "nhwc"      # internal activations kept NHWC-flattened
        c_last = wgt.shape[0]
    # PyTorch flattens the last conv output in NCHW order before the FC; our
    # internal activations are NHWC-flattened, so permute fc_w's rows once.
    latent_dim = fc_w.shape[1]
    fc_w_nhwc = (fc_w.astype(jnp.float32)
                 .reshape(c_last, h, w, latent_dim)
                 .transpose(1, 2, 0, 3)
                 .reshape(c_last * h * w, latent_dim))
    # Zero-pad the FC output to a lane-dense multiple of 128 (wrapper slices).
    n_pad = ((latent_dim + lane_multiple - 1) // lane_multiple) * lane_multiple
    fc_b_row = fc_b.astype(jnp.float32).reshape(1, latent_dim)
    if n_pad != latent_dim:
        fc_w_nhwc = jnp.pad(fc_w_nhwc, ((0, 0), (0, n_pad - latent_dim)))
        fc_b_row = jnp.pad(fc_b_row, ((0, 0), (0, n_pad - latent_dim)))
    dense.append((fc_w_nhwc.astype(jnp.bfloat16), fc_b_row))
    return dense


# ----------------------------------------------------------------------------
# Pure-JAX reference (mirrors PyTorch Conv2d/Linear) for correctness check
# ----------------------------------------------------------------------------
def cnn_encoder_reference(x, conv_params, fc_w, fc_b, stride=2, padding=1):
    h = x
    for (w, b) in conv_params:
        h = lax.conv_general_dilated(
            h, w, window_strides=(stride, stride),
            padding=((padding, padding), (padding, padding)),
            dimension_numbers=("NCHW", "OIHW", "NCHW"),
        ) + b.reshape(1, -1, 1, 1)
        h = jnp.maximum(h, 0.0)
    h = h.reshape(h.shape[0], -1)
    return h @ fc_w + fc_b


# ----------------------------------------------------------------------------
# Deterministic parameter construction (mirrors CNNEncoder layer sizing)
# ----------------------------------------------------------------------------
def init_params(key, input_channels, image_hw, latent_dim,
                num_conv_layers=3, base_filters=8, kernel_size=3, stride=2,
                padding=1):
    H, W = image_hw
    conv_params = []
    cin = input_channels
    h, w = H, W
    for i in range(num_conv_layers):
        cout = base_filters * (2 ** i)
        key, kw_, kb_ = jax.random.split(key, 3)
        wgt = 0.1 * jax.random.normal(kw_, (cout, cin, kernel_size, kernel_size),
                                      dtype=jnp.float32)
        bias = 0.1 * jax.random.normal(kb_, (cout,), dtype=jnp.float32)
        conv_params.append((wgt, bias))
        cin = cout
        h = (h + 2 * padding - kernel_size) // stride + 1
        w = (w + 2 * padding - kernel_size) // stride + 1
    flat_dim = cin * h * w
    key, kfw, kfb = jax.random.split(key, 3)
    fc_w = 0.1 * jax.random.normal(kfw, (flat_dim, latent_dim), dtype=jnp.float32)
    fc_b = 0.1 * jax.random.normal(kfb, (latent_dim,), dtype=jnp.float32)
    return conv_params, fc_w, fc_b


if __name__ == "__main__":
    # Encoder("cnn", image_size=(16,16), patch_size=_, input_channels=4,
    #         latent_dim=32, encoder_params={"base_filters": 8})
    B, C, H, W = 2, 4, 16, 16
    latent_dim = 32

    key = jax.random.PRNGKey(0)
    key, kx = jax.random.split(key)
    x = jax.random.normal(kx, (B, C, H, W), dtype=jnp.float32)

    conv_params, fc_w, fc_b = init_params(
        key, input_channels=C, image_hw=(H, W), latent_dim=latent_dim,
        num_conv_layers=3, base_filters=8, kernel_size=3, stride=2, padding=1)

    # One-time weight preprocessing (not part of the timed forward path).
    dense_params = prepare_dense_params(conv_params, fc_w, fc_b, (H, W),
                                        stride=2, padding=1)
    dense_params = jax.block_until_ready(dense_params)

    fwd = jax.jit(cnn_encoder_forward, static_argnames=("latent_dim",))
    z = jax.block_until_ready(fwd(x, dense_params, latent_dim=latent_dim))
    assert z.shape == (B, latent_dim), z.shape

    z_ref = jax.block_until_ready(cnn_encoder_reference(x, conv_params, fc_w, fc_b))
    # bf16 weights/activation casts (K up to 1024) -> loosened tolerance.
    assert jnp.allclose(z, z_ref, rtol=2e-2, atol=2e-2), \
        float(jnp.max(jnp.abs(z - z_ref)))

    print("KERNEL_OK")
</pallas_src>

<mosaic_0001>
module attributes {stable_mosaic.version = 11 : i64} {
  func.func @_fused_cnn_encoder_kernel(%arg0: memref<2x1024xf32, #tpu.memory_space<vmem>>, %arg1: memref<1024x512xbf16, #tpu.memory_space<vmem>>, %arg2: memref<1x512xf32, #tpu.memory_space<vmem>>, %arg3: memref<512x256xbf16, #tpu.memory_space<vmem>>, %arg4: memref<1x256xf32, #tpu.memory_space<vmem>>, %arg5: memref<256x128xbf16, #tpu.memory_space<vmem>>, %arg6: memref<1x128xf32, #tpu.memory_space<vmem>>, %arg7: memref<128x128xbf16, #tpu.memory_space<vmem>>, %arg8: memref<1x128xf32, #tpu.memory_space<vmem>>, %arg9: memref<2x128xf32, #tpu.memory_space<vmem>>) attributes {dimension_semantics = [], scalar_prefetch = 0 : i64, scratch_operands = 0 : i64, tpu.core_type = #tpu.core_type<tc>} {
    %c0 = arith.constant 0 : index
    %c0_0 = arith.constant 0 : index
    %0 = vector.load %arg0[%c0, %c0_0] : memref<2x1024xf32, #tpu.memory_space<vmem>>, vector<2x1024xf32>
    %1 = arith.truncf %0 : vector<2x1024xf32> to vector<2x1024xbf16>
    %c0_1 = arith.constant 0 : index
    %c0_2 = arith.constant 0 : index
    %2 = vector.load %arg1[%c0_1, %c0_2] : memref<1024x512xbf16, #tpu.memory_space<vmem>>, vector<1024x512xbf16>
    %cst = arith.constant dense<0.000000e+00> : vector<2x512xf32>
    %3 = tpu.matmul %1, %2, %cst {dimension_numbers = #tpu.dot_dimension_numbers<[1], [0], [0], [1], [0, 0, 1, 1], [], []>} : vector<2x1024xbf16>, vector<1024x512xbf16>, vector<2x512xf32> -> vector<2x512xf32>
    %c0_3 = arith.constant 0 : index
    %c0_4 = arith.constant 0 : index
    %4 = vector.load %arg2[%c0_3, %c0_4] : memref<1x512xf32, #tpu.memory_space<vmem>>, vector<1x512xf32>
    %5 = vector.broadcast %4 : vector<1x512xf32> to vector<2x512xf32>
    %6 = arith.addf %3, %5 : vector<2x512xf32>
    %cst_5 = arith.constant 0.000000e+00 : f32
    %7 = vector.broadcast %cst_5 : f32 to vector<2x512xf32>
    %8 = arith.maximumf %6, %7 : vector<2x512xf32>
    %9 = arith.truncf %8 : vector<2x512xf32> to vector<2x512xbf16>
    %c0_6 = arith.constant 0 : index
    %c0_7 = arith.constant 0 : index
    %10 = vector.load %arg3[%c0_6, %c0_7] : memref<512x256xbf16, #tpu.memory_space<vmem>>, vector<512x256xbf16>
    %cst_8 = arith.constant dense<0.000000e+00> : vector<2x256xf32>
    %11 = tpu.matmul %9, %10, %cst_8 {dimension_numbers = #tpu.dot_dimension_numbers<[1], [0], [0], [1], [0, 0, 1, 1], [], []>} : vector<2x512xbf16>, vector<512x256xbf16>, vector<2x256xf32> -> vector<2x256xf32>
    %c0_9 = arith.constant 0 : index
    %c0_10 = arith.constant 0 : index
    %12 = vector.load %arg4[%c0_9, %c0_10] : memref<1x256xf32, #tpu.memory_space<vmem>>, vector<1x256xf32>
    %13 = vector.broadcast %12 : vector<1x256xf32> to vector<2x256xf32>
    %14 = arith.addf %11, %13 : vector<2x256xf32>
    %cst_11 = arith.constant 0.000000e+00 : f32
    %15 = vector.broadcast %cst_11 : f32 to vector<2x256xf32>
    %16 = arith.maximumf %14, %15 : vector<2x256xf32>
    %17 = arith.truncf %16 : vector<2x256xf32> to vector<2x256xbf16>
    %c0_12 = arith.constant 0 : index
    %c0_13 = arith.constant 0 : index
    %18 = vector.load %arg5[%c0_12, %c0_13] : memref<256x128xbf16, #tpu.memory_space<vmem>>, vector<256x128xbf16>
    %cst_14 = arith.constant dense<0.000000e+00> : vector<2x128xf32>
    %19 = tpu.matmul %17, %18, %cst_14 {dimension_numbers = #tpu.dot_dimension_numbers<[1], [0], [0], [1], [0, 0, 1, 1], [], []>} : vector<2x256xbf16>, vector<256x128xbf16>, vector<2x128xf32> -> vector<2x128xf32>
    %c0_15 = arith.constant 0 : index
    %c0_16 = arith.constant 0 : index
    %20 = vector.load %arg6[%c0_15, %c0_16] : memref<1x128xf32, #tpu.memory_space<vmem>>, vector<1x128xf32>
    %21 = vector.broadcast %20 : vector<1x128xf32> to vector<2x128xf32>
    %22 = arith.addf %19, %21 : vector<2x128xf32>
    %cst_17 = arith.constant 0.000000e+00 : f32
    %23 = vector.broadcast %cst_17 : f32 to vector<2x128xf32>
    %24 = arith.maximumf %22, %23 : vector<2x128xf32>
    %25 = arith.truncf %24 : vector<2x128xf32> to vector<2x128xbf16>
    %c0_18 = arith.constant 0 : index
    %c0_19 = arith.constant 0 : index
    %26 = vector.load %arg7[%c0_18, %c0_19] : memref<128x128xbf16, #tpu.memory_space<vmem>>, vector<128x128xbf16>
    %cst_20 = arith.constant dense<0.000000e+00> : vector<2x128xf32>
    %27 = tpu.matmul %25, %26, %cst_20 {dimension_numbers = #tpu.dot_dimension_numbers<[1], [0], [0], [1], [0, 0, 1, 1], [], []>} : vector<2x128xbf16>, vector<128x128xbf16>, vector<2x128xf32> -> vector<2x128xf32>
    %c0_21 = arith.constant 0 : index
    %c0_22 = arith.constant 0 : index
    %28 = vector.load %arg8[%c0_21, %c0_22] : memref<1x128xf32, #tpu.memory_space<vmem>>, vector<1x128xf32>
    %29 = vector.broadcast %28 : vector<1x128xf32> to vector<2x128xf32>
    %30 = arith.addf %27, %29 : vector<2x128xf32>
    %c0_23 = arith.constant 0 : index
    %c0_24 = arith.constant 0 : index
    %31 = vector.load %arg9[%c0_23, %c0_24] : memref<2x128xf32, #tpu.memory_space<vmem>>, vector<2x128xf32>
    tpu.vector_store %arg9[%c0_23, %c0_24], %30 {strides = array<i32>} : memref<2x128xf32, #tpu.memory_space<vmem>>, vector<2x128xf32>,
    return
  }
}

</mosaic_0001>

<bundles_post_ra>
// kernel: cnn_encoder_forward.1
= control target key start
LH: loop header
LB: loop body
LE: loop exit
PB: predicated region body
PF: predicated region fallthrough
CT: control target
= control target key end

     0   :  { %14 = vsyncpa [#allocation3], 0  ;;  %s4036_s0 = inlined_call_operand.vmem [shape: f32[2,1024], index: 0, kind: input, shape index: {}]   ;;  %s4037_s1 = inlined_call_operand.hbm [shape: bf16[1024,512], index: 1, kind: input, shape index: {}]   ;;  %s4038_s2 = inlined_call_operand.vmem [shape: f32[1,512], index: 2, kind: input, shape index: {}]   ;;  %s4039_s3 = inlined_call_operand.hbm [shape: bf16[512,256], index: 3, kind: input, shape index: {}]   ;;  %s4040_s4 = inlined_call_operand.vmem [shape: f32[1,256], index: 4, kind: input, shape index: {}]   ;;  %s4041_s5 = inlined_call_operand.vmem [shape: bf16[256,128], index: 5, kind: input, shape index: {}]   ;;  %s4042_s6 = inlined_call_operand.vmem [shape: f32[1,128], index: 6, kind: input, shape index: {}]   ;;  %s4043_s7 = inlined_call_operand.hbm [shape: bf16[128,128], index: 7, kind: input, shape index: {}]   ;;  %s4044_s8 = inlined_call_operand.vmem [shape: f32[1,128], index: 8, kind: input, shape index: {}]   ;;  %s4045_s9 = inlined_call_operand.hbm [shape: f32[2,128], index: 9, kind: output, shape index: {}]  }
   0x1   :  { %15 = vsyncpa [#allocation6], 0 }
   0x2   :  { %16 = vsyncpa [#allocation4], 0  ;;  %s3812_s30 = smov [#allocation5]  }
   0x3   :  { %s38_s10 = sshll.u32 %s3812_s30, 4  ;;  %s39_s10 = int_to_ptr.vmem [resolvable:$true] %s38_s10 }
   0x4   :  { %s3734_s11 = scalar_lea.vmem %s39_s10, 8192  ;;  %p3739_p1 = scmp.lt.s32.totalorder %s39_s10, %s39_s10 }
   0x5   :  { %p3735_p0 = scmp.ne.s32.totalorder %s39_s10, %s3734_s11  ;;  %p3740_p2 = scmp.lt.s32.totalorder %s3734_s11, %s3734_s11 }
   0x7   :  { %p3741_p3 = por %p3740_p2, %p3739_p1 }
   0x9   :  { %p3742_p4 = pnand %p3741_p3, %p3735_p0 }
   0xb   :  { %3745 = shalt.err (!%p3742_p4)
}
   0xc   :  { %s3813_s12 = smov 128   ;;  %s3814_s13 = smov 8  }
   0xd   :  { %44 = dma.hbm_to_vmem [thread:$0]  %s4039_s3, 8192, %s39_s10, [#allocation6], %s3813_s12, %s3813_s12, %s3814_s13  }
   0xe   :  { %s3815_s16 = smov [#allocation2]  }
   0xf   :  { %s24_s17 = sshll.u32 %s3815_s16, 4  ;;  %s25_s17 = int_to_ptr.vmem [resolvable:$true] %s24_s17 }
  0x10   :  { %s3754_s18 = scalar_lea.vmem %s25_s17, 32768  ;;  %p3759_p6 = scmp.lt.s32.totalorder %s25_s17, %s25_s17 }
  0x11   :  { %p3755_p5 = scmp.ne.s32.totalorder %s25_s17, %s3754_s18  ;;  %p3760_p7 = scmp.lt.s32.totalorder %s3754_s18, %s3754_s18 }
  0x13   :  { %p3761_p8 = por %p3760_p7, %p3759_p6 }
  0x15   :  { %p3762_p9 = pnand %p3761_p8, %p3755_p5 }
  0x17   :  { %3765 = shalt.err (!%p3762_p9)
}
  0x18   :  { %s3816_s19 = smov 256   ;;  %s3817_s20 = smov 16  }
  0x19   :  { %30 = dma.hbm_to_vmem [thread:$0]  %s4037_s1, 32768, %s25_s17, [#allocation3], %s3816_s19, %s3816_s19, %s3817_s20  }
  0x1a   :  { %s3818_s23 = smov [#allocation7]  }
  0x1b   :  { %s56_s24 = sshll.u32 %s3818_s23, 4  ;;  %s57_s24 = int_to_ptr.vmem [resolvable:$true] %s56_s24 }
  0x1c   :  { %s3774_s3 = scalar_lea.vmem %s57_s24, 1024  ;;  %p3779_p11 = scmp.lt.s32.totalorder %s57_s24, %s57_s24 }
  0x1d   :  { %p3775_p10 = scmp.ne.s32.totalorder %s57_s24, %s3774_s3  ;;  %p3780_p12 = scmp.lt.s32.totalorder %s3774_s3, %s3774_s3 }
  0x1f   :  { %p3781_p13 = por %p3780_p12, %p3779_p11 }
  0x21   :  { %p3782_p0 = pnand %p3781_p13, %p3775_p10 }
  0x23   :  { %3785 = shalt.err (!%p3782_p0)
}
  0x24   :  { %s3819_s25 = smov 64   ;;  %s3820_s26 = smov 4  }
  0x25   :  { %62 = dma.hbm_to_vmem [thread:$0]  %s4043_s7, 1024, %s57_s24, [#allocation6], %s3819_s25, %s3819_s25, %s3820_s26  }
  0x26   :  { %3806 = dma.done.wait [#allocation3], 32768  }
  0x27   :  { %3807 = vsyncadd [#allocation3], 4294934528 }
  0x28   :  { %3808 = dma.done.wait [#allocation6], 9216  }
  0x29   :  { %3809 = vsyncadd [#allocation6], 4294958080  ;;  %v3220_v0 = vld [vmem:[#allocation2 + $0xe4] ss:$16 sps:$4 sm:$0xff]   ;;  %v3224_v2 = vld [vmem:[#allocation2 + $0xe0] ss:$16 sps:$4 sm:$0xff]   ;;  %v83_v38 = vlaneseq }
  0x2a   :  { %v3222_v1 = vld [vmem:[#allocation2 + $0x2e4] ss:$16 sps:$4 sm:$0xff]   ;;  %1687 = vmatprep.subr.bf16.mxu0 %v3220_v0  ;;  %v3225_v3 = vld [vmem:[#allocation2 + $0x2e0] ss:$16 sps:$4 sm:$0xff]   ;;  %v3821_v36 = vmov 1983009808  }
  0x2b   :  { %1728 = vmatprep.subr.bf16.mxu1 %v3222_v1  ;;  %v3226_v4 = vld [vmem:[#allocation2 + $0xc4] ss:$16 sps:$4 sm:$0xff]   ;;  %1688 = vmatpush1.bf16.msra.mxu0 %v3224_v2  ;;  %v3230_v6 = vld [vmem:[#allocation2 + $0xc0] ss:$16 sps:$4 sm:$0xff]   ;;  %v81_v37 = vunpack.c.l.s4 %v3821_v36  ;;  %v3884_v43 = vshrl.u32 %v83_v38, 7  ;;  %vm3823_vm0 = vmmov 0  }
  0x2c   :  { %1729 = vmatpush1.bf16.msra.mxu1 %v3225_v3  ;;  %v3228_v5 = vld [vmem:[#allocation2 + $0x2c4] ss:$16 sps:$4 sm:$0xff]   ;;  %1689 = vmatprep.subr.bf16.mxu0 %v3226_v4  ;;  %v3231_v7 = vld [vmem:[#allocation2 + $0x2c0] ss:$16 sps:$4 sm:$0xff]   ;;  %s3824_s20 = smov [#allocation8]  }
  0x2d   :  { %1730 = vmatprep.subr.bf16.mxu1 %v3228_v5  ;;  %v3232_v8 = vld [vmem:[#allocation2 + $0xa4] ss:$16 sps:$4 sm:$0xff]   ;;  %v3236_v10 = vld [vmem:[#allocation2 + $0xa0] ss:$16 sps:$4 sm:$0xff]   ;;  %v82_v42 = vunpack.c.0.s8 %v81_v37  ;;  %s2800_s21 = sshll.u32 %s3824_s20, 4  ;;  %s2801_s21 = int_to_ptr.vmem [resolvable:$true] %s2800_s21 }
  0x2e   :  { %v3234_v9 = vld [vmem:[#allocation2 + $0x2a4] ss:$16 sps:$4 sm:$0xff]   ;;  %v3237_v11 = vld [vmem:[#allocation2 + $0x2a0] ss:$16 sps:$4 sm:$0xff]   ;;  %p3791_p2 = scmp.lt.s32.totalorder %s2801_s21, %s2801_s21 }
  0x2f   :  { %1690 = vmatpush1.bf16.msra.mxu0 %v3230_v6  ;;  %v3238_v12 = vld [vmem:[#allocation2 + $0x84] ss:$16 sps:$4 sm:$0xff]   ;;  %v3242_v14 = vld [vmem:[#allocation2 + $0x80] ss:$16 sps:$4 sm:$0xff]   ;;  %v3887_v49 = vsub.s32 %v82_v42, %v3884_v43  ;;  %v76_v42 = vld [vmem:[%s4036_s0 + $0x8] sm:$0xff] }
  0x30   :  { %1731 = vmatpush1.bf16.msra.mxu1 %v3231_v7  ;;  %1691 = vmatprep.subr.bf16.mxu0 %v3232_v8  ;;  %v3240_v13 = vld [vmem:[#allocation2 + $0x284] ss:$16 sps:$4 sm:$0xff]   ;;  %v3243_v15 = vld [vmem:[#allocation2 + $0x280] ss:$16 sps:$4 sm:$0xff]  }
  0x31   :  { %1732 = vmatprep.subr.bf16.mxu1 %v3234_v9  ;;  %v3244_v16 = vld [vmem:[#allocation2 + $0x64] ss:$16 sps:$4 sm:$0xff]   ;;  %v3248_v18 = vld [vmem:[#allocation2 + $0x60] ss:$16 sps:$4 sm:$0xff]  }
  0x32   :  { %v3246_v17 = vld [vmem:[#allocation2 + $0x264] ss:$16 sps:$4 sm:$0xff]   ;;  %v3249_v19 = vld [vmem:[#allocation2 + $0x260] ss:$16 sps:$4 sm:$0xff]  }
  0x33   :  { %1692 = vmatpush1.bf16.msra.mxu0 %v3236_v10  ;;  %v3250_v20 = vld [vmem:[#allocation2 + $0x44] ss:$16 sps:$4 sm:$0xff]   ;;  %v3254_v22 = vld [vmem:[#allocation2 + $0x40] ss:$16 sps:$4 sm:$0xff]  }
  0x34   :  { %1733 = vmatpush1.bf16.msra.mxu1 %v3237_v11  ;;  %1693 = vmatprep.subr.bf16.mxu0 %v3238_v12  ;;  %v3252_v21 = vld [vmem:[#allocation2 + $0x244] ss:$16 sps:$4 sm:$0xff]   ;;  %v3255_v23 = vld [vmem:[#allocation2 + $0x240] ss:$16 sps:$4 sm:$0xff]  }
  0x35   :  { %1734 = vmatprep.subr.bf16.mxu1 %v3240_v13  ;;  %v3256_v24 = vld [vmem:[#allocation2 + $0x24] ss:$16 sps:$4 sm:$0xff]   ;;  %v3260_v26 = vld [vmem:[#allocation2 + $0x20] ss:$16 sps:$4 sm:$0xff]  }
  0x36   :  { %v3258_v25 = vld [vmem:[#allocation2 + $0x224] ss:$16 sps:$4 sm:$0xff]   ;;  %v3261_v27 = vld [vmem:[#allocation2 + $0x220] ss:$16 sps:$4 sm:$0xff]  }
  0x37   :  { %1694 = vmatpush1.bf16.msra.mxu0 %v3242_v14  ;;  %v3262_v28 = vld [vmem:[#allocation2 + $0x4] ss:$16 sps:$4 sm:$0xff]   ;;  %v3266_v30 = vld [vmem:[#allocation2] ss:$16 sps:$4 sm:$0xff]  }
  0x38   :  { %1735 = vmatpush1.bf16.msra.mxu1 %v3243_v15  ;;  %1695 = vmatprep.subr.bf16.mxu0 %v3244_v16  ;;  %v3264_v29 = vld [vmem:[#allocation2 + $0x204] ss:$16 sps:$4 sm:$0xff]   ;;  %v3267_v31 = vld [vmem:[#allocation2 + $0x200] ss:$16 sps:$4 sm:$0xff]  }
  0x39   :  { %1736 = vmatprep.subr.bf16.mxu1 %v3246_v17  ;;  %v3268_v32 = vld [vmem:[#allocation2 + $0x1e4] ss:$16 sps:$4 sm:$0xff]   ;;  %v3272_v34 = vld [vmem:[#allocation2 + $0x1e0] ss:$16 sps:$4 sm:$0xff]  }
  0x3a   :  { %v3270_v33 = vld [vmem:[#allocation2 + $0x3e4] ss:$16 sps:$4 sm:$0xff]   ;;  %v3273_v35 = vld [vmem:[#allocation2 + $0x3e0] ss:$16 sps:$4 sm:$0xff]  }
  0x3b   :  { %1696 = vmatpush1.bf16.msra.mxu0 %v3248_v18  ;;  %v3274_v39 = vld [vmem:[#allocation2 + $0x1c4] ss:$16 sps:$4 sm:$0xff]   ;;  %v3278_v41 = vld [vmem:[#allocation2 + $0x1c0] ss:$16 sps:$4 sm:$0xff]  }
  0x3c   :  { %1737 = vmatpush1.bf16.msra.mxu1 %v3249_v19  ;;  %1697 = vmatprep.subr.bf16.mxu0 %v3250_v20  ;;  %v3276_v40 = vld [vmem:[#allocation2 + $0x3c4] ss:$16 sps:$4 sm:$0xff]   ;;  %v3279_v44 = vld [vmem:[#allocation2 + $0x3c0] ss:$16 sps:$4 sm:$0xff]  }
  0x3d   :  { %1738 = vmatprep.subr.bf16.mxu1 %v3252_v21  ;;  %v3280_v45 = vld [vmem:[#allocation2 + $0x1a4] ss:$16 sps:$4 sm:$0xff]   ;;  %v3284_v47 = vld [vmem:[#allocation2 + $0x1a0] ss:$16 sps:$4 sm:$0xff]  }
  0x3e   :  { %v3282_v46 = vld [vmem:[#allocation2 + $0x3a4] ss:$16 sps:$4 sm:$0xff]   ;;  %v3285_v48 = vld [vmem:[#allocation2 + $0x3a0] ss:$16 sps:$4 sm:$0xff]  }
  0x3f   :  { %1698 = vmatpush1.bf16.msra.mxu0 %v3254_v22  ;;  %v3286_v50 = vld [vmem:[#allocation2 + $0x184] ss:$16 sps:$4 sm:$0xff]   ;;  %v3290_v53 = vld [vmem:[#allocation2 + $0x180] ss:$16 sps:$4 sm:$0xff]  }
  0x40   :  { %1739 = vmatpush1.bf16.msra.mxu1 %v3255_v23  ;;  %1699 = vmatprep.subr.bf16.mxu0 %v3256_v24  ;;  %v3288_v51 = vld [vmem:[#allocation2 + $0x384] ss:$16 sps:$4 sm:$0xff]   ;;  %v3291_v56 = vld [vmem:[#allocation2 + $0x380] ss:$16 sps:$4 sm:$0xff]  }
  0x41   :  { %1740 = vmatprep.subr.bf16.mxu1 %v3258_v25  ;;  %v75_v52 = vld [vmem:[%s4036_s0] sm:$0xff] }
  0x42   :  { %v86_v54 = vrot.slane %v75_v52, %v3887_v49  ;;  %v79_v55 = vcombine.high %v75_v52, %v75_v52  ;;  %v3292_v57 = vld [vmem:[#allocation2 + $0x164] ss:$16 sps:$4 sm:$0xff]   ;;  %v3296_v61 = vld [vmem:[#allocation2 + $0x160] ss:$16 sps:$4 sm:$0xff]  }
  0x43   :  { %1700 = vmatpush1.bf16.msra.mxu0 %v3260_v26  ;;  %v3294_v58 = vld [vmem:[#allocation2 + $0x364] ss:$16 sps:$4 sm:$0xff]   ;;  %v3297_v0 = vld [vmem:[#allocation2 + $0x360] ss:$16 sps:$4 sm:$0xff]  }
  0x44   :  { %1741 = vmatpush1.bf16.msra.mxu1 %v3261_v27  ;;  %1701 = vmatprep.subr.bf16.mxu0 %v3262_v28  ;;  %v94_v59 = vcombine.high %v86_v54, %v86_v54  ;;  %v93_v60 = vrot.slane %v79_v55, %v3887_v49  ;;  %v3298_v1 = vld [vmem:[#allocation2 + $0x144] ss:$16 sps:$4 sm:$0xff]   ;;  %v3302_v4 = vld [vmem:[#allocation2 + $0x140] ss:$16 sps:$4 sm:$0xff]   ;;  %v3900_v16 = vpack.c.bf16 %v86_v54, %v86_v54 }
  0x45   :  { %1742 = vmatprep.subr.bf16.mxu1 %v3264_v29  ;;  %v3300_v2 = vld [vmem:[#allocation2 + $0x344] ss:$16 sps:$4 sm:$0xff]   ;;  %v3303_v5 = vld [vmem:[#allocation2 + $0x340] ss:$16 sps:$4 sm:$0xff]  }
  0x46   :  { %v3894_v62 = vpack.c.bf16 %v94_v59, %v94_v59  ;;  %v95_v63 = vcombine.high %v93_v60, %v93_v60  ;;  %v3304_v6 = vld [vmem:[#allocation2 + $0x124] ss:$16 sps:$4 sm:$0xff]   ;;  %v3308_v8 = vld [vmem:[#allocation2 + $0x120] ss:$16 sps:$4 sm:$0xff]   ;;  %v3902_v17 = vpack.c.bf16 %v93_v60, %v93_v60 }
  0x47   :  { %1702 = vmatpush1.bf16.msra.mxu0 %v3266_v30  ;;  %v3306_v7 = vld [vmem:[#allocation2 + $0x324] ss:$16 sps:$4 sm:$0xff]   ;;  %v3309_v9 = vld [vmem:[#allocation2 + $0x320] ss:$16 sps:$4 sm:$0xff]  }
  0x48   :  { %1743 = vmatpush1.bf16.msra.mxu1 %v3267_v31  ;;  %1703 = vmatprep.subr.bf16.mxu0 %v3268_v32  ;;  %v3896_v3 = vpack.c.bf16 %v95_v63, %v95_v63  ;;  %v3310_v10 = vld [vmem:[#allocation2 + $0x104] ss:$16 sps:$4 sm:$0xff]   ;;  %v3314_v12 = vld [vmem:[#allocation2 + $0x100] ss:$16 sps:$4 sm:$0xff]  }
  0x49   :  { %1744 = vmatprep.subr.bf16.mxu1 %v3270_v33  ;;  %1719 = vmatprep.mubr.bf16.mxu0 %v3894_v62  ;;  %v3312_v11 = vld [vmem:[#allocation2 + $0x304] ss:$16 sps:$4 sm:$0xff]   ;;  %v3315_v13 = vld [vmem:[#allocation2 + $0x300] ss:$16 sps:$4 sm:$0xff]  }
  0x4a   :  { %1760 = vmatprep.mubr.bf16.mxu1 %v3896_v3  ;;  %v3319_v14 = vld [vmem:[#allocation2 + $0x4e4] ss:$16 sps:$4 sm:$0xff]   ;;  %v3317_v18 = vld [vmem:[#allocation2 + $0x4e0] ss:$16 sps:$4 sm:$0xff]  }
  0x4b   :  { %1704 = vmatpush2.bf16.msra.mxu0 %v3272_v34  ;;  %v3322_v15 = vld [vmem:[#allocation2 + $0x6e4] ss:$16 sps:$4 sm:$0xff]   ;;  %v3320_v19 = vld [vmem:[#allocation2 + $0x6e0] ss:$16 sps:$4 sm:$0xff]  }
  0x4c   :  { %1745 = vmatpush2.bf16.msra.mxu1 %v3273_v35  ;;  %1705 = vmatprep.subr.bf16.mxu0 %v3274_v39  ;;  %v3325_v20 = vld [vmem:[#allocation2 + $0x4c4] ss:$16 sps:$4 sm:$0xff]   ;;  %v3323_v22 = vld [vmem:[#allocation2 + $0x4c0] ss:$16 sps:$4 sm:$0xff]  }
  0x4d   :  { %1746 = vmatprep.subr.bf16.mxu1 %v3276_v40  ;;  %v3328_v21 = vld [vmem:[#allocation2 + $0x6c4] ss:$16 sps:$4 sm:$0xff]   ;;  %v3326_v23 = vld [vmem:[#allocation2 + $0x6c0] ss:$16 sps:$4 sm:$0xff]  }
  0x4e   :  { %v3331_v24 = vld [vmem:[#allocation2 + $0x4a4] ss:$16 sps:$4 sm:$0xff]   ;;  %v3329_v26 = vld [vmem:[#allocation2 + $0x4a0] ss:$16 sps:$4 sm:$0xff]  }
  0x4f   :  { %1706 = vmatpush2.bf16.msra.mxu0 %v3278_v41  ;;  %v3334_v25 = vld [vmem:[#allocation2 + $0x6a4] ss:$16 sps:$4 sm:$0xff]   ;;  %v3332_v27 = vld [vmem:[#allocation2 + $0x6a0] ss:$16 sps:$4 sm:$0xff]  }
  0x50   :  { %1747 = vmatpush2.bf16.msra.mxu1 %v3279_v44  ;;  %1707 = vmatprep.subr.bf16.mxu0 %v3280_v45  ;;  %v3337_v28 = vld [vmem:[#allocation2 + $0x484] ss:$16 sps:$4 sm:$0xff]   ;;  %v3335_v30 = vld [vmem:[#allocation2 + $0x480] ss:$16 sps:$4 sm:$0xff]   ;;  %v3910_v44 = vrot.slane %v76_v42, %v3887_v49  ;;  %v96_v45 = vcombine.high %v76_v42, %v76_v42  ;;  %v3429_v42 = vld [vmem:[#allocation2 + $0x2a8] ss:$16 sps:$4 sm:$0xff]  }
  0x51   :  { %1748 = vmatprep.subr.bf16.mxu1 %v3282_v46  ;;  %v3340_v29 = vld [vmem:[#allocation2 + $0x684] ss:$16 sps:$4 sm:$0xff]   ;;  %v3338_v31 = vld [vmem:[#allocation2 + $0x680] ss:$16 sps:$4 sm:$0xff]  }
  0x52   :  { %v3343_v32 = vld [vmem:[#allocation2 + $0x464] ss:$16 sps:$4 sm:$0xff]   ;;  %v3341_v34 = vld [vmem:[#allocation2 + $0x460] ss:$16 sps:$4 sm:$0xff]  }
  0x53   :  { %1708 = vmatpush2.bf16.msra.mxu0 %v3284_v47  ;;  %v3346_v33 = vld [vmem:[#allocation2 + $0x664] ss:$16 sps:$4 sm:$0xff]   ;;  %v3344_v35 = vld [vmem:[#allocation2 + $0x660] ss:$16 sps:$4 sm:$0xff]  }
  0x54   :  { %1749 = vmatpush2.bf16.msra.mxu1 %v3285_v48  ;;  %1709 = vmatprep.subr.bf16.mxu0 %v3286_v50  ;;  %v3349_v36 = vld [vmem:[#allocation2 + $0x444] ss:$16 sps:$4 sm:$0xff]   ;;  %v3347_v38 = vld [vmem:[#allocation2 + $0x440] ss:$16 sps:$4 sm:$0xff]   ;;  %v111_v48 = vcombine.high %v3910_v44, %v3910_v44  ;;  %v3915_v50 = vrot.slane %v96_v45, %v3887_v49  ;;  %v3437_v45 = vld [vmem:[#allocation2 + $0x28c] ss:$16 sps:$4 sm:$0xff]  }
  0x55   :  { %1750 = vmatprep.subr.bf16.mxu1 %v3288_v51  ;;  %v3352_v37 = vld [vmem:[#allocation2 + $0x644] ss:$16 sps:$4 sm:$0xff]   ;;  %v3350_v39 = vld [vmem:[#allocation2 + $0x640] ss:$16 sps:$4 sm:$0xff]  }
  0x56   :  { %v3355_v40 = vld [vmem:[#allocation2 + $0x424] ss:$16 sps:$4 sm:$0xff]   ;;  %v3353_v46 = vld [vmem:[#allocation2 + $0x420] ss:$16 sps:$4 sm:$0xff]   ;;  %v112_v54 = vcombine.high %v3915_v50, %v3915_v50 }
  0x57   :  { %1710 = vmatpush2.bf16.msra.mxu0 %v3290_v53  ;;  %v3358_v41 = vld [vmem:[#allocation2 + $0x624] ss:$16 sps:$4 sm:$0xff]   ;;  %v3356_v47 = vld [vmem:[#allocation2 + $0x620] ss:$16 sps:$4 sm:$0xff]   ;;  %v3917_v53 = vpack.c.bf16 %v111_v48, %v111_v48  ;;  %v3440_v48 = vld [vmem:[#allocation2 + $0x6c] ss:$16 sps:$4 sm:$0xff]  }
  0x58   :  { %1751 = vmatpush2.bf16.msra.mxu1 %v3291_v56  ;;  %1711 = vmatprep.subr.bf16.mxu0 %v3292_v57  ;;  %v3361_v51 = vld [vmem:[#allocation2 + $0x404] ss:$16 sps:$4 sm:$0xff]   ;;  %v3359_v55 = vld [vmem:[#allocation2 + $0x400] ss:$16 sps:$4 sm:$0xff]   ;;  %v3921_v57 = vpack.c.bf16 %v112_v54, %v112_v54  ;;  %v3444_v54 = vld [vmem:[#allocation2 + $0x48] ss:$16 sps:$4 sm:$0xff]  }
  0x59   :  { %1752 = vmatprep.subr.bf16.mxu1 %v3294_v58  ;;  %v3364_v52 = vld [vmem:[#allocation2 + $0x604] ss:$16 sps:$4 sm:$0xff]   ;;  %v3362_v56 = vld [vmem:[#allocation2 + $0x600] ss:$16 sps:$4 sm:$0xff]  }
  0x5a   :  { %v3367_v58 = vld [vmem:[#allocation2 + $0x5e4] ss:$16 sps:$4 sm:$0xff]   ;;  %v3365_v59 = vld [vmem:[#allocation2 + $0x5e0] ss:$16 sps:$4 sm:$0xff]  }
  0x5b   :  { %1712 = vmatpush2.bf16.msra.mxu0 %v3296_v61  ;;  %v3370_v49 = vld [vmem:[#allocation2 + $0x7e4] ss:$16 sps:$4 sm:$0xff]   ;;  %v3368_v60 = vld [vmem:[#allocation2 + $0x7e0] ss:$16 sps:$4 sm:$0xff]  }
  0x5c   :  { %1753 = vmatpush2.bf16.msra.mxu1 %v3297_v0  ;;  %1713 = vmatprep.subr.bf16.mxu0 %v3298_v1  ;;  %v3373_v61 = vld [vmem:[#allocation2 + $0x5c4] ss:$16 sps:$4 sm:$0xff]   ;;  %v3371_v0 = vld [vmem:[#allocation2 + $0x5c0] ss:$16 sps:$4 sm:$0xff]  }
  0x5d   :  { %1754 = vmatprep.subr.bf16.mxu1 %v3300_v2  ;;  %v3376_v63 = vld [vmem:[#allocation2 + $0x7c4] ss:$16 sps:$4 sm:$0xff]   ;;  %v3374_v1 = vld [vmem:[#allocation2 + $0x7c0] ss:$16 sps:$4 sm:$0xff]  }
  0x5e   :  { %v3379_v2 = vld [vmem:[#allocation2 + $0x5a4] ss:$16 sps:$4 sm:$0xff]  }
  0x5f   :  { %1714 = vmatpush2.bf16.msra.mxu0 %v3302_v4  ;;  %v3382_v4 = vld [vmem:[#allocation2 + $0x7a4] ss:$16 sps:$4 sm:$0xff]  }
  0x60   :  { %1755 = vmatpush2.bf16.msra.mxu1 %v3303_v5  ;;  %1715 = vmatprep.subr.bf16.mxu0 %v3304_v6  ;;  %v3377_v5 = vld [vmem:[#allocation2 + $0x5a0] ss:$16 sps:$4 sm:$0xff]  }
  0x61   :  { %1756 = vmatprep.subr.bf16.mxu1 %v3306_v7  ;;  %v3380_v6 = vld [vmem:[#allocation2 + $0x7a0] ss:$16 sps:$4 sm:$0xff]   ;;  %v3385_v7 = vld [vmem:[#allocation2 + $0x584] ss:$16 sps:$4 sm:$0xff]  }
  0x63   :  { %1716 = vmatpush2.bf16.msra.mxu0 %v3308_v8  ;;  %v3388_v8 = vld [vmem:[#allocation2 + $0x784] ss:$16 sps:$4 sm:$0xff]  }
  0x64   :  { %1757 = vmatpush2.bf16.msra.mxu1 %v3309_v9  ;;  %1717 = vmatprep.subr.bf16.mxu0 %v3310_v10  ;;  %v3383_v9 = vld [vmem:[#allocation2 + $0x580] ss:$16 sps:$4 sm:$0xff]  }
  0x65   :  { %1758 = vmatprep.subr.bf16.mxu1 %v3312_v11  ;;  %v3386_v10 = vld [vmem:[#allocation2 + $0x780] ss:$16 sps:$4 sm:$0xff]   ;;  %v3391_v11 = vld [vmem:[#allocation2 + $0x564] ss:$16 sps:$4 sm:$0xff]  }
  0x67   :  { %1718 = vmatpush2.bf16.msra.mxu0 %v3314_v12  ;;  %v3394_v12 = vld [vmem:[#allocation2 + $0x764] ss:$16 sps:$4 sm:$0xff]  }
  0x68   :  { %1759 = vmatpush2.bf16.msra.mxu1 %v3315_v13  ;;  %1769 = vmatprep.subr.bf16.mxu0 %v3319_v14  ;;  %v3389_v13 = vld [vmem:[#allocation2 + $0x560] ss:$16 sps:$4 sm:$0xff]  }
  0x69   :  { %1810 = vmatprep.subr.bf16.mxu1 %v3322_v15  ;;  %v3392_v14 = vld [vmem:[#allocation2 + $0x760] ss:$16 sps:$4 sm:$0xff]   ;;  %v3397_v15 = vld [vmem:[#allocation2 + $0x544] ss:$16 sps:$4 sm:$0xff]  }
  0x6a   :  { %1720 = vmatmul.mubr.bf16.vlgmr.msra.gmra.mxu0 %v3900_v16 }
  0x6b   :  { %1761 = vmatmul.mubr.bf16.vlgmr.msra.gmra.mxu1 %v3902_v17  ;;  %1770 = vmatpush1.bf16.msra.mxu0 %v3317_v18  ;;  %v3400_v18 = vld [vmem:[#allocation2 + $0x744] ss:$16 sps:$4 sm:$0xff]  }
  0x6c   :  { %1811 = vmatpush1.bf16.msra.mxu1 %v3320_v19  ;;  %1771 = vmatprep.subr.bf16.mxu0 %v3325_v20  ;;  %v3395_v19 = vld [vmem:[#allocation2 + $0x540] ss:$16 sps:$4 sm:$0xff]  }
  0x6d   :  { %1812 = vmatprep.subr.bf16.mxu1 %v3328_v21  ;;  %1801 = vmatprep.mubr.bf16.mxu0 %v3917_v53  ;;  %v3398_v20 = vld [vmem:[#allocation2 + $0x740] ss:$16 sps:$4 sm:$0xff]   ;;  %v3403_v21 = vld [vmem:[#allocation2 + $0x524] ss:$16 sps:$4 sm:$0xff]  }
  0x6e   :  { %1842 = vmatprep.mubr.bf16.mxu1 %v3921_v57 }
  0x6f   :  { %1772 = vmatpush1.bf16.msra.mxu0 %v3323_v22  ;;  %v3406_v22 = vld [vmem:[#allocation2 + $0x724] ss:$16 sps:$4 sm:$0xff]  }
  0x70   :  { %1813 = vmatpush1.bf16.msra.mxu1 %v3326_v23  ;;  %1773 = vmatprep.subr.bf16.mxu0 %v3331_v24  ;;  %v3401_v23 = vld [vmem:[#allocation2 + $0x520] ss:$16 sps:$4 sm:$0xff]  }
  0x71   :  { %1814 = vmatprep.subr.bf16.mxu1 %v3334_v25  ;;  %v3404_v24 = vld [vmem:[#allocation2 + $0x720] ss:$16 sps:$4 sm:$0xff]   ;;  %v3409_v25 = vld [vmem:[#allocation2 + $0x504] ss:$16 sps:$4 sm:$0xff]  }
  0x73   :  { %1774 = vmatpush1.bf16.msra.mxu0 %v3329_v26  ;;  %v3412_v26 = vld [vmem:[#allocation2 + $0x704] ss:$16 sps:$4 sm:$0xff]  }
  0x74   :  { %1815 = vmatpush1.bf16.msra.mxu1 %v3332_v27  ;;  %1775 = vmatprep.subr.bf16.mxu0 %v3337_v28  ;;  %v3407_v27 = vld [vmem:[#allocation2 + $0x500] ss:$16 sps:$4 sm:$0xff]  }
  0x75   :  { %1816 = vmatprep.subr.bf16.mxu1 %v3340_v29  ;;  %v3410_v28 = vld [vmem:[#allocation2 + $0x700] ss:$16 sps:$4 sm:$0xff]   ;;  %v3416_v29 = vld [vmem:[#allocation2 + $0xec] ss:$16 sps:$4 sm:$0xff]  }
  0x77   :  { %1776 = vmatpush1.bf16.msra.mxu0 %v3335_v30  ;;  %v3419_v30 = vld [vmem:[#allocation2 + $0x2ec] ss:$16 sps:$4 sm:$0xff]  }
  0x78   :  { %1817 = vmatpush1.bf16.msra.mxu1 %v3338_v31  ;;  %1777 = vmatprep.subr.bf16.mxu0 %v3343_v32  ;;  %v3927_v31 = vpack.c.bf16 %v3910_v44, %v3910_v44  ;;  %v3931_v32 = vpack.c.bf16 %v3915_v50, %v3915_v50  ;;  %v3434_v44 = vld [vmem:[#allocation2 + $0x8c] ss:$16 sps:$4 sm:$0xff]  }
  0x79   :  { %1818 = vmatprep.subr.bf16.mxu1 %v3346_v33  ;;  %v3414_v33 = vld [vmem:[#allocation2 + $0xe8] ss:$16 sps:$4 sm:$0xff]   ;;  %v3443_v50 = vld [vmem:[#allocation2 + $0x26c] ss:$16 sps:$4 sm:$0xff]  }
  0x7b   :  { %1778 = vmatpush1.bf16.msra.mxu0 %v3341_v34  ;;  %v3417_v34 = vld [vmem:[#allocation2 + $0x2e8] ss:$16 sps:$4 sm:$0xff]  }
  0x7c   :  { %1819 = vmatpush1.bf16.msra.mxu1 %v3344_v35  ;;  %1779 = vmatprep.subr.bf16.mxu0 %v3349_v36  ;;  %v3422_v35 = vld [vmem:[#allocation2 + $0xcc] ss:$16 sps:$4 sm:$0xff]  }
  0x7d   :  { %1820 = vmatprep.subr.bf16.mxu1 %v3352_v37  ;;  %v3425_v36 = vld [vmem:[#allocation2 + $0x2cc] ss:$16 sps:$4 sm:$0xff]   ;;  %v3420_v37 = vld [vmem:[#allocation2 + $0xc8] ss:$16 sps:$4 sm:$0xff]  }
  0x7f   :  { %1780 = vmatpush1.bf16.msra.mxu0 %v3347_v38  ;;  %v3423_v38 = vld [vmem:[#allocation2 + $0x2c8] ss:$16 sps:$4 sm:$0xff]  }
  0x80   :  { %1821 = vmatpush1.bf16.msra.mxu1 %v3350_v39  ;;  %1781 = vmatprep.subr.bf16.mxu0 %v3355_v40  ;;  %v3428_v39 = vld [vmem:[#allocation2 + $0xac] ss:$16 sps:$4 sm:$0xff]  }
  0x81   :  { %1822 = vmatprep.subr.bf16.mxu1 %v3358_v41  ;;  %v3431_v40 = vld [vmem:[#allocation2 + $0x2ac] ss:$16 sps:$4 sm:$0xff]   ;;  %v3426_v41 = vld [vmem:[#allocation2 + $0xa8] ss:$16 sps:$4 sm:$0xff]  }
  0x83   :  { %1782 = vmatpush1.bf16.msra.mxu0 %v3353_v46  ;;  %v3432_v46 = vld [vmem:[#allocation2 + $0x88] ss:$16 sps:$4 sm:$0xff]  }
  0x84   :  { %1823 = vmatpush1.bf16.msra.mxu1 %v3356_v47  ;;  %1783 = vmatprep.subr.bf16.mxu0 %v3361_v51  ;;  %v3435_v47 = vld [vmem:[#allocation2 + $0x288] ss:$16 sps:$4 sm:$0xff]   ;;  %v3446_v51 = vld [vmem:[#allocation2 + $0x4c] ss:$16 sps:$4 sm:$0xff]  }
  0x85   :  { %1824 = vmatprep.subr.bf16.mxu1 %v3364_v52  ;;  %v3449_v52 = vld [vmem:[#allocation2 + $0x24c] ss:$16 sps:$4 sm:$0xff]  }
  0x87   :  { %1784 = vmatpush1.bf16.msra.mxu0 %v3359_v55  ;;  %v3447_v55 = vld [vmem:[#allocation2 + $0x248] ss:$16 sps:$4 sm:$0xff]  }
  0x88   :  { %1825 = vmatpush1.bf16.msra.mxu1 %v3362_v56  ;;  %1785 = vmatprep.subr.bf16.mxu0 %v3367_v58  ;;  %v3452_v56 = vld [vmem:[#allocation2 + $0x2c] ss:$16 sps:$4 sm:$0xff]  }
  0x89   :  { %1826 = vmatprep.subr.bf16.mxu1 %v3370_v49  ;;  %v3455_v58 = vld [vmem:[#allocation2 + $0x22c] ss:$16 sps:$4 sm:$0xff]   ;;  %v3450_v49 = vld [vmem:[#allocation2 + $0x28] ss:$16 sps:$4 sm:$0xff]  }
  0x8b   :  { %1786 = vmatpush2.bf16.msra.mxu0 %v3365_v59  ;;  %v3453_v59 = vld [vmem:[#allocation2 + $0x228] ss:$16 sps:$4 sm:$0xff]  }
  0x8c   :  { %1827 = vmatpush2.bf16.msra.mxu1 %v3368_v60  ;;  %1787 = vmatprep.subr.bf16.mxu0 %v3373_v61  ;;  %v3458_v60 = vld [vmem:[#allocation2 + $0xc] ss:$16 sps:$4 sm:$0xff]  }
  0x8d   :  { %1828 = vmatprep.subr.bf16.mxu1 %v3376_v63  ;;  %v3461_v61 = vld [vmem:[#allocation2 + $0x20c] ss:$16 sps:$4 sm:$0xff]   ;;  %v3456_v63 = vld [vmem:[#allocation2 + $0x8] ss:$16 sps:$4 sm:$0xff]  }
  0x8f   :  { %1788 = vmatpush2.bf16.msra.mxu0 %v3371_v0  ;;  %v3459_v0 = vld [vmem:[#allocation2 + $0x208] ss:$16 sps:$4 sm:$0xff]  }
  0x90   :  { %1829 = vmatpush2.bf16.msra.mxu1 %v3374_v1  ;;  %1789 = vmatprep.subr.bf16.mxu0 %v3379_v2  ;;  %v3464_v1 = vld [vmem:[#allocation2 + $0x1ec] ss:$16 sps:$4 sm:$0xff]  }
  0x91   :  { %1830 = vmatprep.subr.bf16.mxu1 %v3382_v4  ;;  %v3467_v2 = vld [vmem:[#allocation2 + $0x3ec] ss:$16 sps:$4 sm:$0xff]   ;;  %v3462_v4 = vld [vmem:[#allocation2 + $0x1e8] ss:$16 sps:$4 sm:$0xff]  }
  0x93   :  { %1790 = vmatpush2.bf16.msra.mxu0 %v3377_v5  ;;  %v3465_v5 = vld [vmem:[#allocation2 + $0x3e8] ss:$16 sps:$4 sm:$0xff]  }
  0x94   :  { %1831 = vmatpush2.bf16.msra.mxu1 %v3380_v6  ;;  %1791 = vmatprep.subr.bf16.mxu0 %v3385_v7  ;;  %v3470_v6 = vld [vmem:[#allocation2 + $0x1cc] ss:$16 sps:$4 sm:$0xff]  }
  0x95   :  { %1832 = vmatprep.subr.bf16.mxu1 %v3388_v8  ;;  %v3473_v7 = vld [vmem:[#allocation2 + $0x3cc] ss:$16 sps:$4 sm:$0xff]   ;;  %v3468_v8 = vld [vmem:[#allocation2 + $0x1c8] ss:$16 sps:$4 sm:$0xff]  }
  0x97   :  { %1792 = vmatpush2.bf16.msra.mxu0 %v3383_v9  ;;  %v3471_v9 = vld [vmem:[#allocation2 + $0x3c8] ss:$16 sps:$4 sm:$0xff]  }
  0x98   :  { %1833 = vmatpush2.bf16.msra.mxu1 %v3386_v10  ;;  %1793 = vmatprep.subr.bf16.mxu0 %v3391_v11  ;;  %v3476_v10 = vld [vmem:[#allocation2 + $0x1ac] ss:$16 sps:$4 sm:$0xff]  }
  0x99   :  { %1834 = vmatprep.subr.bf16.mxu1 %v3394_v12  ;;  %v3479_v11 = vld [vmem:[#allocation2 + $0x3ac] ss:$16 sps:$4 sm:$0xff]   ;;  %v3474_v12 = vld [vmem:[#allocation2 + $0x1a8] ss:$16 sps:$4 sm:$0xff]  }
  0x9b   :  { %1794 = vmatpush2.bf16.msra.mxu0 %v3389_v13  ;;  %v3477_v13 = vld [vmem:[#allocation2 + $0x3a8] ss:$16 sps:$4 sm:$0xff]  }
  0x9c   :  { %1835 = vmatpush2.bf16.msra.mxu1 %v3392_v14  ;;  %1795 = vmatprep.subr.bf16.mxu0 %v3397_v15  ;;  %v3482_v14 = vld [vmem:[#allocation2 + $0x18c] ss:$16 sps:$4 sm:$0xff]  }
  0x9d   :  { %1836 = vmatprep.subr.bf16.mxu1 %v3400_v18  ;;  %v3485_v15 = vld [vmem:[#allocation2 + $0x38c] ss:$16 sps:$4 sm:$0xff]   ;;  %v3480_v18 = vld [vmem:[#allocation2 + $0x188] ss:$16 sps:$4 sm:$0xff]  }
  0x9f   :  { %1796 = vmatpush2.bf16.msra.mxu0 %v3395_v19  ;;  %v3483_v19 = vld [vmem:[#allocation2 + $0x388] ss:$16 sps:$4 sm:$0xff]  }
  0xa0   :  { %1837 = vmatpush2.bf16.msra.mxu1 %v3398_v20  ;;  %1797 = vmatprep.subr.bf16.mxu0 %v3403_v21  ;;  %v3488_v20 = vld [vmem:[#allocation2 + $0x16c] ss:$16 sps:$4 sm:$0xff]  }
  0xa1   :  { %1838 = vmatprep.subr.bf16.mxu1 %v3406_v22  ;;  %v3491_v21 = vld [vmem:[#allocation2 + $0x36c] ss:$16 sps:$4 sm:$0xff]   ;;  %v3486_v22 = vld [vmem:[#allocation2 + $0x168] ss:$16 sps:$4 sm:$0xff]  }
  0xa3   :  { %1798 = vmatpush2.bf16.msra.mxu0 %v3401_v23  ;;  %v3489_v23 = vld [vmem:[#allocation2 + $0x368] ss:$16 sps:$4 sm:$0xff]  }
  0xa4   :  { %1839 = vmatpush2.bf16.msra.mxu1 %v3404_v24  ;;  %1799 = vmatprep.subr.bf16.mxu0 %v3409_v25  ;;  %v3494_v24 = vld [vmem:[#allocation2 + $0x14c] ss:$16 sps:$4 sm:$0xff]  }
  0xa5   :  { %1840 = vmatprep.subr.bf16.mxu1 %v3412_v26  ;;  %v3497_v25 = vld [vmem:[#allocation2 + $0x34c] ss:$16 sps:$4 sm:$0xff]   ;;  %v3492_v26 = vld [vmem:[#allocation2 + $0x148] ss:$16 sps:$4 sm:$0xff]  }
  0xa7   :  { %1800 = vmatpush2.bf16.msra.mxu0 %v3407_v27  ;;  %v3495_v27 = vld [vmem:[#allocation2 + $0x348] ss:$16 sps:$4 sm:$0xff]  }
  0xa8   :  { %1841 = vmatpush2.bf16.msra.mxu1 %v3410_v28  ;;  %1851 = vmatprep.subr.bf16.mxu0 %v3416_v29  ;;  %v3500_v28 = vld [vmem:[#allocation2 + $0x12c] ss:$16 sps:$4 sm:$0xff]  }
  0xa9   :  { %1892 = vmatprep.subr.bf16.mxu1 %v3419_v30  ;;  %v3503_v29 = vld [vmem:[#allocation2 + $0x32c] ss:$16 sps:$4 sm:$0xff]   ;;  %v3498_v30 = vld [vmem:[#allocation2 + $0x128] ss:$16 sps:$4 sm:$0xff]  }
  0xaa   :  { %1802 = vmatmul.mubr.bf16.vlgmr.msra.gmra.mxu0 %v3927_v31 }
  0xab   :  { %1843 = vmatmul.mubr.bf16.vlgmr.msra.gmra.mxu1 %v3931_v32  ;;  %1852 = vmatpush1.bf16.msra.mxu0 %v3414_v33  ;;  %v3501_v33 = vld [vmem:[#allocation2 + $0x328] ss:$16 sps:$4 sm:$0xff]  }
  0xac   :  { %1893 = vmatpush1.bf16.msra.mxu1 %v3417_v34  ;;  %1853 = vmatprep.subr.bf16.mxu0 %v3422_v35  ;;  %v3506_v34 = vld [vmem:[#allocation2 + $0x10c] ss:$16 sps:$4 sm:$0xff]  }
  0xad   :  { %1894 = vmatprep.subr.bf16.mxu1 %v3425_v36  ;;  %1883 = vmatprep.mubr.bf16.mxu0 %v3894_v62  ;;  %v3438_v62 = vld [vmem:[#allocation2 + $0x68] ss:$16 sps:$4 sm:$0xff]   ;;  %v3509_v35 = vld [vmem:[#allocation2 + $0x30c] ss:$16 sps:$4 sm:$0xff]  }
  0xae   :  { %1924 = vmatprep.mubr.bf16.mxu1 %v3896_v3  ;;  %v3441_v3 = vld [vmem:[#allocation2 + $0x268] ss:$16 sps:$4 sm:$0xff]  }
  0xaf   :  { %1854 = vmatpush1.bf16.msra.mxu0 %v3420_v37  ;;  %v3504_v36 = vld [vmem:[#allocation2 + $0x108] ss:$16 sps:$4 sm:$0xff]  }
  0xb0   :  { %1895 = vmatpush1.bf16.msra.mxu1 %v3423_v38  ;;  %1855 = vmatprep.subr.bf16.mxu0 %v3428_v39  ;;  %v3507_v37 = vld [vmem:[#allocation2 + $0x308] ss:$16 sps:$4 sm:$0xff]   ;;  %v3512_v38 = vld [vmem:[#allocation2 + $0x4ec] ss:$16 sps:$4 sm:$0xff]  }
  0xb1   :  { %1896 = vmatprep.subr.bf16.mxu1 %v3431_v40  ;;  %v3515_v39 = vld [vmem:[#allocation2 + $0x6ec] ss:$16 sps:$4 sm:$0xff]   ;;  %v3510_v40 = vld [vmem:[#allocation2 + $0x4e8] ss:$16 sps:$4 sm:$0xff]  }
  0xb3   :  { %1856 = vmatpush1.bf16.msra.mxu0 %v3426_v41  ;;  %v3513_v41 = vld [vmem:[#allocation2 + $0x6e8] ss:$16 sps:$4 sm:$0xff]  }
  0xb4   :  { %1897 = vmatpush1.bf16.msra.mxu1 %v3429_v42  ;;  %1857 = vmatprep.subr.bf16.mxu0 %v3434_v44  ;;  %v3518_v42 = vld [vmem:[#allocation2 + $0x4cc] ss:$16 sps:$4 sm:$0xff]  }
  0xb5   :  { %1898 = vmatprep.subr.bf16.mxu1 %v3437_v45  ;;  %v3521_v44 = vld [vmem:[#allocation2 + $0x6cc] ss:$16 sps:$4 sm:$0xff]   ;;  %v3516_v45 = vld [vmem:[#allocation2 + $0x4c8] ss:$16 sps:$4 sm:$0xff]  }
  0xb7   :  { %1858 = vmatpush1.bf16.msra.mxu0 %v3432_v46  ;;  %v3519_v46 = vld [vmem:[#allocation2 + $0x6c8] ss:$16 sps:$4 sm:$0xff]  }
  0xb8   :  { %1899 = vmatpush1.bf16.msra.mxu1 %v3435_v47  ;;  %1859 = vmatprep.subr.bf16.mxu0 %v3440_v48  ;;  %v3524_v47 = vld [vmem:[#allocation2 + $0x4ac] ss:$16 sps:$4 sm:$0xff]  }
  0xb9   :  { %1900 = vmatprep.subr.bf16.mxu1 %v3443_v50  ;;  %v3527_v48 = vld [vmem:[#allocation2 + $0x6ac] ss:$16 sps:$4 sm:$0xff]   ;;  %v3522_v50 = vld [vmem:[#allocation2 + $0x4a8] ss:$16 sps:$4 sm:$0xff]  }
  0xbb   :  { %1860 = vmatpush1.bf16.msra.mxu0 %v3438_v62  ;;  %v3525_v62 = vld [vmem:[#allocation2 + $0x6a8] ss:$16 sps:$4 sm:$0xff]  }
  0xbc   :  { %1901 = vmatpush1.bf16.msra.mxu1 %v3441_v3  ;;  %1861 = vmatprep.subr.bf16.mxu0 %v3446_v51  ;;  %v3530_v3 = vld [vmem:[#allocation2 + $0x48c] ss:$16 sps:$4 sm:$0xff]   ;;  %v3528_v51 = vld [vmem:[#allocation2 + $0x488] ss:$16 sps:$4 sm:$0xff]  }
  0xbd   :  { %1902 = vmatprep.subr.bf16.mxu1 %v3449_v52  ;;  %v3536_v52 = vld [vmem:[#allocation2 + $0x46c] ss:$16 sps:$4 sm:$0xff]  }
  0xbf   :  { %1862 = vmatpush1.bf16.msra.mxu0 %v3444_v54  ;;  %v3539_v54 = vld [vmem:[#allocation2 + $0x66c] ss:$16 sps:$4 sm:$0xff]  }
  0xc0   :  { %1903 = vmatpush1.bf16.msra.mxu1 %v3447_v55  ;;  %1863 = vmatprep.subr.bf16.mxu0 %v3452_v56  ;;  %v3534_v55 = vld [vmem:[#allocation2 + $0x468] ss:$16 sps:$4 sm:$0xff]  }
  0xc1   :  { %1904 = vmatprep.subr.bf16.mxu1 %v3455_v58  ;;  %v3537_v56 = vld [vmem:[#allocation2 + $0x668] ss:$16 sps:$4 sm:$0xff]   ;;  %v3542_v58 = vld [vmem:[#allocation2 + $0x44c] ss:$16 sps:$4 sm:$0xff]  }
  0xc3   :  { %1864 = vmatpush1.bf16.msra.mxu0 %v3450_v49  ;;  %v3543_v49 = vld [vmem:[#allocation2 + $0x648] ss:$16 sps:$4 sm:$0xff]  }
  0xc4   :  { %1905 = vmatpush1.bf16.msra.mxu1 %v3453_v59  ;;  %1865 = vmatprep.subr.bf16.mxu0 %v3458_v60  ;;  %v3548_v59 = vld [vmem:[#allocation2 + $0x42c] ss:$16 sps:$4 sm:$0xff]  }
  0xc5   :  { %1906 = vmatprep.subr.bf16.mxu1 %v3461_v61  ;;  %v3551_v60 = vld [vmem:[#allocation2 + $0x62c] ss:$16 sps:$4 sm:$0xff]   ;;  %v3546_v61 = vld [vmem:[#allocation2 + $0x428] ss:$16 sps:$4 sm:$0xff]  }
  0xc7   :  { %1866 = vmatpush1.bf16.msra.mxu0 %v3456_v63  ;;  %v3549_v63 = vld [vmem:[#allocation2 + $0x628] ss:$16 sps:$4 sm:$0xff]  }
  0xc8   :  { %1907 = vmatpush1.bf16.msra.mxu1 %v3459_v0  ;;  %1867 = vmatprep.subr.bf16.mxu0 %v3464_v1  ;;  %v3554_v0 = vld [vmem:[#allocation2 + $0x40c] ss:$16 sps:$4 sm:$0xff]  }
  0xc9   :  { %1908 = vmatprep.subr.bf16.mxu1 %v3467_v2  ;;  %v3557_v1 = vld [vmem:[#allocation2 + $0x60c] ss:$16 sps:$4 sm:$0xff]   ;;  %v3552_v2 = vld [vmem:[#allocation2 + $0x408] ss:$16 sps:$4 sm:$0xff]  }
  0xcb   :  { %1868 = vmatpush2.bf16.msra.mxu0 %v3462_v4  ;;  %v3555_v4 = vld [vmem:[#allocation2 + $0x608] ss:$16 sps:$4 sm:$0xff]  }
  0xcc   :  { %1909 = vmatpush2.bf16.msra.mxu1 %v3465_v5  ;;  %1869 = vmatprep.subr.bf16.mxu0 %v3470_v6  ;;  %v3560_v5 = vld [vmem:[#allocation2 + $0x5ec] ss:$16 sps:$4 sm:$0xff]  }
  0xcd   :  { %1910 = vmatprep.subr.bf16.mxu1 %v3473_v7  ;;  %v3563_v6 = vld [vmem:[#allocation2 + $0x7ec] ss:$16 sps:$4 sm:$0xff]   ;;  %v3558_v7 = vld [vmem:[#allocation2 + $0x5e8] ss:$16 sps:$4 sm:$0xff]  }
  0xcf   :  { %1870 = vmatpush2.bf16.msra.mxu0 %v3468_v8  ;;  %v3561_v8 = vld [vmem:[#allocation2 + $0x7e8] ss:$16 sps:$4 sm:$0xff]  }
  0xd0   :  { %1911 = vmatpush2.bf16.msra.mxu1 %v3471_v9  ;;  %1871 = vmatprep.subr.bf16.mxu0 %v3476_v10  ;;  %v3566_v9 = vld [vmem:[#allocation2 + $0x5cc] ss:$16 sps:$4 sm:$0xff]  }
  0xd1   :  { %1912 = vmatprep.subr.bf16.mxu1 %v3479_v11  ;;  %v3569_v10 = vld [vmem:[#allocation2 + $0x7cc] ss:$16 sps:$4 sm:$0xff]   ;;  %v3564_v11 = vld [vmem:[#allocation2 + $0x5c8] ss:$16 sps:$4 sm:$0xff]  }
  0xd3   :  { %1872 = vmatpush2.bf16.msra.mxu0 %v3474_v12  ;;  %v3567_v12 = vld [vmem:[#allocation2 + $0x7c8] ss:$16 sps:$4 sm:$0xff]  }
  0xd4   :  { %1913 = vmatpush2.bf16.msra.mxu1 %v3477_v13  ;;  %1873 = vmatprep.subr.bf16.mxu0 %v3482_v14  ;;  %v3572_v13 = vld [vmem:[#allocation2 + $0x5ac] ss:$16 sps:$4 sm:$0xff]  }
  0xd5   :  { %1914 = vmatprep.subr.bf16.mxu1 %v3485_v15  ;;  %v3575_v14 = vld [vmem:[#allocation2 + $0x7ac] ss:$16 sps:$4 sm:$0xff]   ;;  %v3570_v15 = vld [vmem:[#allocation2 + $0x5a8] ss:$16 sps:$4 sm:$0xff]  }
  0xd7   :  { %1874 = vmatpush2.bf16.msra.mxu0 %v3480_v18  ;;  %v3573_v18 = vld [vmem:[#allocation2 + $0x7a8] ss:$16 sps:$4 sm:$0xff]  }
  0xd8   :  { %1915 = vmatpush2.bf16.msra.mxu1 %v3483_v19  ;;  %1875 = vmatprep.subr.bf16.mxu0 %v3488_v20  ;;  %v3578_v19 = vld [vmem:[#allocation2 + $0x58c] ss:$16 sps:$4 sm:$0xff]  }
  0xd9   :  { %1916 = vmatprep.subr.bf16.mxu1 %v3491_v21  ;;  %v3581_v20 = vld [vmem:[#allocation2 + $0x78c] ss:$16 sps:$4 sm:$0xff]   ;;  %v3576_v21 = vld [vmem:[#allocation2 + $0x588] ss:$16 sps:$4 sm:$0xff]  }
  0xdb   :  { %1876 = vmatpush2.bf16.msra.mxu0 %v3486_v22  ;;  %v3579_v22 = vld [vmem:[#allocation2 + $0x788] ss:$16 sps:$4 sm:$0xff]  }
  0xdc   :  { %1917 = vmatpush2.bf16.msra.mxu1 %v3489_v23  ;;  %1877 = vmatprep.subr.bf16.mxu0 %v3494_v24  ;;  %v3584_v23 = vld [vmem:[#allocation2 + $0x56c] ss:$16 sps:$4 sm:$0xff]  }
  0xdd   :  { %1918 = vmatprep.subr.bf16.mxu1 %v3497_v25  ;;  %v3587_v24 = vld [vmem:[#allocation2 + $0x76c] ss:$16 sps:$4 sm:$0xff]   ;;  %v3582_v25 = vld [vmem:[#allocation2 + $0x568] ss:$16 sps:$4 sm:$0xff]  }
  0xdf   :  { %1878 = vmatpush2.bf16.msra.mxu0 %v3492_v26  ;;  %v3585_v26 = vld [vmem:[#allocation2 + $0x768] ss:$16 sps:$4 sm:$0xff]  }
  0xe0   :  { %1919 = vmatpush2.bf16.msra.mxu1 %v3495_v27  ;;  %1879 = vmatprep.subr.bf16.mxu0 %v3500_v28  ;;  %v3590_v27 = vld [vmem:[#allocation2 + $0x54c] ss:$16 sps:$4 sm:$0xff]  }
  0xe1   :  { %1920 = vmatprep.subr.bf16.mxu1 %v3503_v29  ;;  %v3593_v28 = vld [vmem:[#allocation2 + $0x74c] ss:$16 sps:$4 sm:$0xff]   ;;  %v3588_v29 = vld [vmem:[#allocation2 + $0x548] ss:$16 sps:$4 sm:$0xff]  }
  0xe3   :  { %1880 = vmatpush2.bf16.msra.mxu0 %v3498_v30  ;;  %v3591_v30 = vld [vmem:[#allocation2 + $0x748] ss:$16 sps:$4 sm:$0xff]  }
  0xe4   :  { %1921 = vmatpush2.bf16.msra.mxu1 %v3501_v33  ;;  %1881 = vmatprep.subr.bf16.mxu0 %v3506_v34  ;;  %v3596_v33 = vld [vmem:[#allocation2 + $0x52c] ss:$16 sps:$4 sm:$0xff]  }
  0xe5   :  { %1922 = vmatprep.subr.bf16.mxu1 %v3509_v35  ;;  %v3599_v34 = vld [vmem:[#allocation2 + $0x72c] ss:$16 sps:$4 sm:$0xff]   ;;  %v3594_v35 = vld [vmem:[#allocation2 + $0x528] ss:$16 sps:$4 sm:$0xff]  }
  0xe7   :  { %1882 = vmatpush2.bf16.msra.mxu0 %v3504_v36  ;;  %v3597_v36 = vld [vmem:[#allocation2 + $0x728] ss:$16 sps:$4 sm:$0xff]  }
  0xe8   :  { %1923 = vmatpush2.bf16.msra.mxu1 %v3507_v37  ;;  %1933 = vmatprep.subr.bf16.mxu0 %v3512_v38  ;;  %v3602_v37 = vld [vmem:[#allocation2 + $0x50c] ss:$16 sps:$4 sm:$0xff]  }
  0xe9   :  { %1974 = vmatprep.subr.bf16.mxu1 %v3515_v39  ;;  %v3605_v38 = vld [vmem:[#allocation2 + $0x70c] ss:$16 sps:$4 sm:$0xff]   ;;  %v3600_v39 = vld [vmem:[#allocation2 + $0x508] ss:$16 sps:$4 sm:$0xff]  }
  0xea   :  { %1884 = vmatmul.mubr.bf16.vlgmr.msra.gmra.mxu0 %v3900_v16  ;;  %v3533_v16 = vld [vmem:[#allocation2 + $0x68c] ss:$16 sps:$4 sm:$0xff]  }
  0xeb   :  { %1925 = vmatmul.mubr.bf16.vlgmr.msra.gmra.mxu1 %v3902_v17  ;;  %1934 = vmatpush1.bf16.msra.mxu0 %v3510_v40  ;;  %v3531_v17 = vld [vmem:[#allocation2 + $0x688] ss:$16 sps:$4 sm:$0xff]  }
  0xec   :  { %1975 = vmatpush1.bf16.msra.mxu1 %v3513_v41  ;;  %1935 = vmatprep.subr.bf16.mxu0 %v3518_v42  ;;  %v3603_v40 = vld [vmem:[#allocation2 + $0x708] ss:$16 sps:$4 sm:$0xff]   ;;  %v3608_v41 = vld [vmem:[#allocation5 + $0x74] ss:$8 sps:$4 sm:$0xff]  }
  0xed   :  { %1976 = vmatprep.subr.bf16.mxu1 %v3521_v44  ;;  %1965 = vmatprep.mubr.bf16.mxu0 %v3917_v53  ;;  %v3545_v53 = vld [vmem:[#allocation2 + $0x64c] ss:$16 sps:$4 sm:$0xff]   ;;  %v3606_v42 = vld [vmem:[#allocation5 + $0x70] ss:$8 sps:$4 sm:$0xff]  }
  0xee   :  { %2006 = vmatprep.mubr.bf16.mxu1 %v3921_v57  ;;  %v3540_v57 = vld [vmem:[#allocation2 + $0x448] ss:$16 sps:$4 sm:$0xff]   ;;  %v3611_v44 = vld [vmem:[#allocation5 + $0x64] ss:$8 sps:$4 sm:$0xff]  }
  0xef   :  { %1936 = vmatpush1.bf16.msra.mxu0 %v3516_v45 }
  0xf0   :  { %1977 = vmatpush1.bf16.msra.mxu1 %v3519_v46  ;;  %1937 = vmatprep.subr.bf16.mxu0 %v3524_v47  ;;  %v3609_v47 = vld [vmem:[#allocation5 + $0x60] ss:$8 sps:$4 sm:$0xff]  }
  0xf1   :  { %1978 = vmatprep.subr.bf16.mxu1 %v3527_v48 }
  0xf3   :  { %1938 = vmatpush1.bf16.msra.mxu0 %v3522_v50 }
  0xf4   :  { %1979 = vmatpush1.bf16.msra.mxu1 %v3525_v62  ;;  %1939 = vmatprep.subr.bf16.mxu0 %v3530_v3  ;;  %v3614_v62 = vld [vmem:[#allocation5 + $0x54] ss:$8 sps:$4 sm:$0xff]  }
  0xf5   :  { %1980 = vmatprep.subr.bf16.mxu1 %v3533_v16 }
  0xf7   :  { %1940 = vmatpush1.bf16.msra.mxu0 %v3528_v51  ;;  %v3612_v51 = vld [vmem:[#allocation5 + $0x50] ss:$8 sps:$4 sm:$0xff]  }
  0xf8   :  { %1981 = vmatpush1.bf16.msra.mxu1 %v3531_v17  ;;  %1941 = vmatprep.subr.bf16.mxu0 %v3536_v52 }
  0xf9   :  { %1982 = vmatprep.subr.bf16.mxu1 %v3539_v54  ;;  %v3617_v54 = vld [vmem:[#allocation5 + $0x44] ss:$8 sps:$4 sm:$0xff]  }
  0xfb   :  { %1942 = vmatpush1.bf16.msra.mxu0 %v3534_v55  ;;  %v3654_v55 = vld [vmem:[#allocation5 + $0x170] ss:$8 sps:$4 sm:$0xff]  }
  0xfc   :  { %1983 = vmatpush1.bf16.msra.mxu1 %v3537_v56  ;;  %1943 = vmatprep.subr.bf16.mxu0 %v3542_v58  ;;  %v3659_v56 = vld [vmem:[#allocation5 + $0x164] ss:$8 sps:$4 sm:$0xff]   ;;  %v3657_v58 = vld [vmem:[#allocation5 + $0x160] ss:$8 sps:$4 sm:$0xff]  }
  0xfd   :  { %1984 = vmatprep.subr.bf16.mxu1 %v3545_v53  ;;  %v3620_v53 = vld [vmem:[#allocation5 + $0x34] ss:$8 sps:$4 sm:$0xff]  }
  0xff   :  { %1944 = vmatpush1.bf16.msra.mxu0 %v3540_v57  ;;  %v3662_v57 = vld [vmem:[#allocation5 + $0x154] ss:$8 sps:$4 sm:$0xff]  }
 0x100   :  { %1985 = vmatpush1.bf16.msra.mxu1 %v3543_v49  ;;  %1945 = vmatprep.subr.bf16.mxu0 %v3548_v59  ;;  %v3618_v49 = vld [vmem:[#allocation5 + $0x30] ss:$8 sps:$4 sm:$0xff]  }
 0x101   :  { %1986 = vmatprep.subr.bf16.mxu1 %v3551_v60  ;;  %v3660_v59 = vld [vmem:[#allocation5 + $0x150] ss:$8 sps:$4 sm:$0xff]   ;;  %v3623_v60 = vld [vmem:[#allocation5 + $0x24] ss:$8 sps:$4 sm:$0xff]  }
 0x103   :  { %1946 = vmatpush1.bf16.msra.mxu0 %v3546_v61  ;;  %v3665_v61 = vld [vmem:[#allocation5 + $0x144] ss:$8 sps:$4 sm:$0xff]  }
 0x104   :  { %1987 = vmatpush1.bf16.msra.mxu1 %v3549_v63  ;;  %1947 = vmatprep.subr.bf16.mxu0 %v3554_v0  ;;  %v3621_v63 = vld [vmem:[#allocation5 + $0x20] ss:$8 sps:$4 sm:$0xff]  }
 0x105   :  { %1988 = vmatprep.subr.bf16.mxu1 %v3557_v1  ;;  %v3663_v0 = vld [vmem:[#allocation5 + $0x140] ss:$8 sps:$4 sm:$0xff]   ;;  %v3626_v1 = vld [vmem:[#allocation5 + $0x14] ss:$8 sps:$4 sm:$0xff]  }
 0x107   :  { %1948 = vmatpush1.bf16.msra.mxu0 %v3552_v2  ;;  %v3668_v2 = vld [vmem:[#allocation5 + $0x134] ss:$8 sps:$4 sm:$0xff]  }
 0x108   :  { %1989 = vmatpush1.bf16.msra.mxu1 %v3555_v4  ;;  %1949 = vmatprep.subr.bf16.mxu0 %v3560_v5  ;;  %v3624_v4 = vld [vmem:[#allocation5 + $0x10] ss:$8 sps:$4 sm:$0xff]  }
 0x109   :  { %1990 = vmatprep.subr.bf16.mxu1 %v3563_v6  ;;  %v3666_v5 = vld [vmem:[#allocation5 + $0x130] ss:$8 sps:$4 sm:$0xff]   ;;  %v3629_v6 = vld [vmem:[#allocation5 + $0x4] ss:$8 sps:$4 sm:$0xff]  }
 0x10b   :  { %1950 = vmatpush2.bf16.msra.mxu0 %v3558_v7  ;;  %v3671_v7 = vld [vmem:[#allocation5 + $0x124] ss:$8 sps:$4 sm:$0xff]  }
 0x10c   :  { %1991 = vmatpush2.bf16.msra.mxu1 %v3561_v8  ;;  %1951 = vmatprep.subr.bf16.mxu0 %v3566_v9  ;;  %v3627_v8 = vld [vmem:[#allocation5] ss:$8 sps:$4 sm:$0xff]  }
 0x10d   :  { %1992 = vmatprep.subr.bf16.mxu1 %v3569_v10  ;;  %v3669_v9 = vld [vmem:[#allocation5 + $0x120] ss:$8 sps:$4 sm:$0xff]   ;;  %v3632_v10 = vld [vmem:[#allocation5 + $0xf4] ss:$8 sps:$4 sm:$0xff]  }
 0x10f   :  { %1952 = vmatpush2.bf16.msra.mxu0 %v3564_v11  ;;  %v3674_v11 = vld [vmem:[#allocation5 + $0x114] ss:$8 sps:$4 sm:$0xff]  }
 0x110   :  { %1993 = vmatpush2.bf16.msra.mxu1 %v3567_v12  ;;  %1953 = vmatprep.subr.bf16.mxu0 %v3572_v13  ;;  %v3630_v12 = vld [vmem:[#allocation5 + $0xf0] ss:$8 sps:$4 sm:$0xff]  }
 0x111   :  { %1994 = vmatprep.subr.bf16.mxu1 %v3575_v14  ;;  %v3672_v13 = vld [vmem:[#allocation5 + $0x110] ss:$8 sps:$4 sm:$0xff]   ;;  %v3635_v14 = vld [vmem:[#allocation5 + $0xe4] ss:$8 sps:$4 sm:$0xff]  }
 0x113   :  { %1954 = vmatpush2.bf16.msra.mxu0 %v3570_v15  ;;  %v3677_v15 = vld [vmem:[#allocation5 + $0x104] ss:$8 sps:$4 sm:$0xff]  }
 0x114   :  { %1995 = vmatpush2.bf16.msra.mxu1 %v3573_v18  ;;  %1955 = vmatprep.subr.bf16.mxu0 %v3578_v19  ;;  %v3633_v18 = vld [vmem:[#allocation5 + $0xe0] ss:$8 sps:$4 sm:$0xff]  }
 0x115   :  { %1996 = vmatprep.subr.bf16.mxu1 %v3581_v20  ;;  %v3675_v19 = vld [vmem:[#allocation5 + $0x100] ss:$8 sps:$4 sm:$0xff]   ;;  %v3638_v20 = vld [vmem:[#allocation5 + $0xd4] ss:$8 sps:$4 sm:$0xff]  }
 0x117   :  { %1956 = vmatpush2.bf16.msra.mxu0 %v3576_v21  ;;  %v3680_v21 = vld [vmem:[#allocation5 + $0x1f4] ss:$8 sps:$4 sm:$0xff]  }
 0x118   :  { %1997 = vmatpush2.bf16.msra.mxu1 %v3579_v22  ;;  %1957 = vmatprep.subr.bf16.mxu0 %v3584_v23  ;;  %v3636_v22 = vld [vmem:[#allocation5 + $0xd0] ss:$8 sps:$4 sm:$0xff]  }
 0x119   :  { %1998 = vmatprep.subr.bf16.mxu1 %v3587_v24  ;;  %v3678_v23 = vld [vmem:[#allocation5 + $0x1f0] ss:$8 sps:$4 sm:$0xff]   ;;  %v3641_v24 = vld [vmem:[#allocation5 + $0xc4] ss:$8 sps:$4 sm:$0xff]  }
 0x11b   :  { %1958 = vmatpush2.bf16.msra.mxu0 %v3582_v25  ;;  %v3683_v25 = vld [vmem:[#allocation5 + $0x1e4] ss:$8 sps:$4 sm:$0xff]  }
 0x11c   :  { %1999 = vmatpush2.bf16.msra.mxu1 %v3585_v26  ;;  %1959 = vmatprep.subr.bf16.mxu0 %v3590_v27  ;;  %v3639_v26 = vld [vmem:[#allocation5 + $0xc0] ss:$8 sps:$4 sm:$0xff]  }
 0x11d   :  { %2000 = vmatprep.subr.bf16.mxu1 %v3593_v28  ;;  %v3681_v27 = vld [vmem:[#allocation5 + $0x1e0] ss:$8 sps:$4 sm:$0xff]   ;;  %v3644_v28 = vld [vmem:[#allocation5 + $0xb4] ss:$8 sps:$4 sm:$0xff]  }
 0x11f   :  { %1960 = vmatpush2.bf16.msra.mxu0 %v3588_v29  ;;  %v3686_v29 = vld [vmem:[#allocation5 + $0x1d4] ss:$8 sps:$4 sm:$0xff]  }
 0x120   :  { %2001 = vmatpush2.bf16.msra.mxu1 %v3591_v30  ;;  %1961 = vmatprep.subr.bf16.mxu0 %v3596_v33  ;;  %v3642_v30 = vld [vmem:[#allocation5 + $0xb0] ss:$8 sps:$4 sm:$0xff]  }
 0x121   :  { %2002 = vmatprep.subr.bf16.mxu1 %v3599_v34  ;;  %v3684_v33 = vld [vmem:[#allocation5 + $0x1d0] ss:$8 sps:$4 sm:$0xff]   ;;  %v3647_v34 = vld [vmem:[#allocation5 + $0xa4] ss:$8 sps:$4 sm:$0xff]  }
 0x123   :  { %1962 = vmatpush2.bf16.msra.mxu0 %v3594_v35  ;;  %v3689_v35 = vld [vmem:[#allocation5 + $0x1c4] ss:$8 sps:$4 sm:$0xff]  }
 0x124   :  { %2003 = vmatpush2.bf16.msra.mxu1 %v3597_v36  ;;  %1963 = vmatprep.subr.bf16.mxu0 %v3602_v37  ;;  %v3645_v36 = vld [vmem:[#allocation5 + $0xa0] ss:$8 sps:$4 sm:$0xff]  }
 0x125   :  { %2004 = vmatprep.subr.bf16.mxu1 %v3605_v38  ;;  %v3687_v37 = vld [vmem:[#allocation5 + $0x1c0] ss:$8 sps:$4 sm:$0xff]   ;;  %v3650_v38 = vld [vmem:[#allocation5 + $0x94] ss:$8 sps:$4 sm:$0xff]  }
 0x127   :  { %1964 = vmatpush2.bf16.msra.mxu0 %v3600_v39  ;;  %v3692_v39 = vld [vmem:[#allocation5 + $0x1b4] ss:$8 sps:$4 sm:$0xff]  }
 0x128   :  { %2005 = vmatpush2.bf16.msra.mxu1 %v3603_v40  ;;  %2419 = vmatprep.subr.bf16.mxu0 %v3608_v41  ;;  %v389_v40 = vsub.s32 0, %v3884_v43  ;;  %v3955_v41 = vld [vmem:[%s4038_s2] sm:$0xf] }
 0x12a   :  { %v3941_v45 = vpop.f32.mrf.mxu0  ;;  %1966 = vmatmul.mubr.bf16.vlgmr.msra.gmra.mxu0 %v3927_v31  ;;  %v3656_v31 = vld [vmem:[#allocation5 + $0x174] ss:$8 sps:$4 sm:$0xff]  }
 0x12b   :  { %v3943_v46 = vpop.f32.mrf.mxu1  ;;  %2007 = vmatmul.mubr.bf16.vlgmr.msra.gmra.mxu1 %v3931_v32  ;;  %2420 = vmatpush1.bf16.msra.mxu0 %v3606_v42  ;;  %v3615_v32 = vld [vmem:[#allocation5 + $0x40] ss:$8 sps:$4 sm:$0xff]   ;;  %v393_v42 = vsub.s32 1, %v3884_v43 }
 0x12c   :  { %v3947_v48 = vpop.f32.mrf.mxu0  ;;  %2421 = vmatprep.subr.bf16.mxu0 %v3611_v44  ;;  %2460 = vmatprep.subr.bf16.mxu1 %v3656_v31  ;;  %v3648_v44 = vld [vmem:[#allocation5 + $0x90] ss:$8 sps:$4 sm:$0xff]   ;;  %v3693_v31 = vld [vmem:[#allocation5 + $0x1a0] ss:$8 sps:$4 sm:$0xff]  }
 0x12d   :  { %v3949_v50 = vpop.f32.mrf.mxu1  ;;  %2461 = vmatpush1.bf16.msra.mxu1 %v3654_v55 }
 0x12e   :  { %v1725_v3 = vpop.f32.mrf.mxu0  ;;  %2462 = vmatprep.subr.bf16.mxu1 %v3659_v56 }
 0x12f   :  { %v1766_v16 = vpop.f32.mrf.mxu1  ;;  %2422 = vmatpush1.bf16.msra.mxu0 %v3609_v47  ;;  %v3690_v47 = vld [vmem:[#allocation5 + $0x1b0] ss:$8 sps:$4 sm:$0xff]   ;;  %v390_v3 = vrot.slane %v3955_v41, %v389_v40 }
 0x130   :  { %v1726_v17 = vpop.f32.mrf.mxu0  ;;  %2423 = vmatprep.subr.bf16.mxu0 %v3614_v62  ;;  %v3653_v62 = vld [vmem:[#allocation5 + $0x84] ss:$8 sps:$4 sm:$0xff]   ;;  %v394_v16 = vrot.slane %v3955_v41, %v393_v42 }
 0x131   :  { %v1767_v52 = vpop.f32.mrf.mxu1  ;;  %2463 = vmatpush1.bf16.msra.mxu1 %v3657_v58  ;;  %v1722_v17 = vadd.f32 %v3941_v45, %v390_v3  ;;  %v3696_v45 = vld [vmem:[#allocation5 + $0x190] ss:$8 sps:$4 sm:$0xff]  }
 0x132   :  { %2464 = vmatprep.subr.bf16.mxu1 %v3662_v57  ;;  %v1724_v52 = vadd.f32 %v3947_v48, %v394_v16 }
 0x133   :  { %2424 = vmatpush1.bf16.msra.mxu0 %v3612_v51  ;;  %v3651_v51 = vld [vmem:[#allocation5 + $0x80] ss:$8 sps:$4 sm:$0xff]   ;;  %v1763_v55 = vadd.f32 %v3943_v46, %v1722_v17 }
 0x134   :  { %2425 = vmatprep.subr.bf16.mxu0 %v3617_v54  ;;  %v3695_v54 = vld [vmem:[#allocation5 + $0x1a4] ss:$8 sps:$4 sm:$0xff]   ;;  %v1765_v58 = vadd.f32 %v3949_v50, %v1724_v52 }
 0x135   :  { %2465 = vmatpush1.bf16.msra.mxu1 %v3660_v59  ;;  %v3698_v59 = vld [vmem:[#allocation5 + $0x194] ss:$8 sps:$4 sm:$0xff]  }
 0x136   :  { %2466 = vmatprep.subr.bf16.mxu1 %v3665_v61 }
 0x137   :  { %2426 = vmatpush1.bf16.msra.mxu0 %v3615_v32 }
 0x138   :  { %2427 = vmatprep.subr.bf16.mxu0 %v3620_v53 }
 0x139   :  { %2467 = vmatpush1.bf16.msra.mxu1 %v3663_v0 }
 0x13a   :  { %2468 = vmatprep.subr.bf16.mxu1 %v3668_v2 }
 0x13b   :  { %2428 = vmatpush1.bf16.msra.mxu0 %v3618_v49 }
 0x13c   :  { %2429 = vmatprep.subr.bf16.mxu0 %v3623_v60 }
 0x13d   :  { %2469 = vmatpush1.bf16.msra.mxu1 %v3666_v5 }
 0x13e   :  { %2470 = vmatprep.subr.bf16.mxu1 %v3671_v7 }
 0x13f   :  { %2430 = vmatpush1.bf16.msra.mxu0 %v3621_v63 }
 0x140   :  { %2431 = vmatprep.subr.bf16.mxu0 %v3626_v1 }
 0x141   :  { %2471 = vmatpush1.bf16.msra.mxu1 %v3669_v9 }
 0x142   :  { %2472 = vmatprep.subr.bf16.mxu1 %v3674_v11 }
 0x143   :  { %2432 = vmatpush1.bf16.msra.mxu0 %v3624_v4  ;;  %v3701_v4 = vld [vmem:[#allocation5 + $0x184] ss:$8 sps:$4 sm:$0xff]  }
 0x144   :  { %2433 = vmatprep.subr.bf16.mxu0 %v3629_v6  ;;  %v3699_v6 = vld [vmem:[#allocation5 + $0x180] ss:$8 sps:$4 sm:$0xff]  }
 0x145   :  { %2473 = vmatpush1.bf16.msra.mxu1 %v3672_v13 }
 0x146   :  { %2474 = vmatprep.subr.bf16.mxu1 %v3677_v15 }
 0x147   :  { %2434 = vmatpush1.bf16.msra.mxu0 %v3627_v8 }
 0x148   :  { %2435 = vmatprep.subr.bf16.mxu0 %v3632_v10 }
 0x149   :  { %2475 = vmatpush1.bf16.msra.mxu1 %v3675_v19  ;;  %v3703_v19 = vld [vmem:[%s4041_s5 + $0x38] sm:$0xff]  }
 0x14a   :  { %2476 = vmatprep.subr.bf16.mxu1 %v3680_v21  ;;  %v3705_v21 = vld [vmem:[%s4041_s5 + $0x30] sm:$0xff]  }
 0x14b   :  { %2436 = vmatpush2.bf16.msra.mxu0 %v3630_v12 }
 0x14c   :  { %2437 = vmatprep.subr.bf16.mxu0 %v3635_v14 }
 0x14d   :  { %2477 = vmatpush2.bf16.msra.mxu1 %v3678_v23  ;;  %v3707_v23 = vld [vmem:[%s4041_s5 + $0x28] sm:$0xff]  }
 0x14e   :  { %2478 = vmatprep.subr.bf16.mxu1 %v3683_v25  ;;  %v3709_v25 = vld [vmem:[%s4041_s5 + $0x20] sm:$0xff]  }
 0x14f   :  { %2438 = vmatpush2.bf16.msra.mxu0 %v3633_v18  ;;  %v3702_v18 = vld [vmem:[%s4041_s5 + $0x78] sm:$0xff]  }
 0x150   :  { %2439 = vmatprep.subr.bf16.mxu0 %v3638_v20  ;;  %v3704_v20 = vld [vmem:[%s4041_s5 + $0x70] sm:$0xff]  }
 0x151   :  { %2479 = vmatpush2.bf16.msra.mxu1 %v3681_v27  ;;  %v3711_v27 = vld [vmem:[%s4041_s5 + $0x18] sm:$0xff]  }
 0x152   :  { %2480 = vmatprep.subr.bf16.mxu1 %v3686_v29  ;;  %v3713_v29 = vld [vmem:[%s4041_s5 + $0x10] sm:$0xff]  }
 0x153   :  { %2440 = vmatpush2.bf16.msra.mxu0 %v3636_v22  ;;  %v3706_v22 = vld [vmem:[%s4041_s5 + $0x68] sm:$0xff]  }
 0x154   :  { %2441 = vmatprep.subr.bf16.mxu0 %v3641_v24  ;;  %v3708_v24 = vld [vmem:[%s4041_s5 + $0x60] sm:$0xff]  }
 0x155   :  { %2481 = vmatpush2.bf16.msra.mxu1 %v3684_v33  ;;  %v401_v33 = vsub.s32 3, %v3884_v43 }
 0x156   :  { %2482 = vmatprep.subr.bf16.mxu1 %v3689_v35 }
 0x157   :  { %2442 = vmatpush2.bf16.msra.mxu0 %v3639_v26  ;;  %v3710_v26 = vld [vmem:[%s4041_s5 + $0x58] sm:$0xff]   ;;  %v402_v35 = vrot.slane %v3955_v41, %v401_v33  ;;  %v3147_v33 = vld [vmem:[%s4044_s8] ss:$0 sm:$0xff] }
 0x158   :  { %2443 = vmatprep.subr.bf16.mxu0 %v3644_v28  ;;  %v3712_v28 = vld [vmem:[%s4041_s5 + $0x50] sm:$0xff]  }
 0x159   :  { %2483 = vmatpush2.bf16.msra.mxu1 %v3687_v37 }
 0x15a   :  { %2484 = vmatprep.subr.bf16.mxu1 %v3692_v39 }
 0x15b   :  { %2444 = vmatpush2.bf16.msra.mxu0 %v3642_v30  ;;  %v397_v30 = vsub.s32 2, %v3884_v43  ;;  %v3725_v43 = vld [vmem:[#allocation7] sm:$0xff]  }
 0x15c   :  { %2445 = vmatprep.subr.bf16.mxu0 %v3647_v34 }
 0x15d   :  { %2485 = vmatpush2.bf16.msra.mxu1 %v3690_v47  ;;  %v398_v34 = vrot.slane %v3955_v41, %v397_v30 }
 0x15e   :  { %2486 = vmatprep.subr.bf16.mxu1 %v3695_v54 }
 0x15f   :  { %2446 = vmatpush2.bf16.msra.mxu0 %v3645_v36 }
 0x160   :  { %2447 = vmatprep.subr.bf16.mxu0 %v3650_v38 }
 0x161   :  { %2487 = vmatpush2.bf16.msra.mxu1 %v3693_v31 }
 0x162   :  { %2488 = vmatprep.subr.bf16.mxu1 %v3698_v59  ;;  %v3715_v59 = vld [vmem:[%s4041_s5 + $0x8] sm:$0xff]  }
 0x163   :  { %2448 = vmatpush2.bf16.msra.mxu0 %v3648_v44 }
 0x164   :  { %2449 = vmatprep.subr.bf16.mxu0 %v3653_v62 }
 0x165   :  { %2489 = vmatpush2.bf16.msra.mxu1 %v3696_v45  ;;  %v3716_v45 = vld [vmem:[%s4041_s5 + $0x40] sm:$0xff]  }
 0x166   :  { %2490 = vmatprep.subr.bf16.mxu1 %v3701_v4  ;;  %v3721_v4 = vld [vmem:[#allocation7 + $0x20] sm:$0xff]  }
 0x167   :  { %2450 = vmatpush2.bf16.msra.mxu0 %v3651_v51 }
 0x168   :  { %3156 = vmatprep.subr.bf16.mxu0 %v3702_v18 }
 0x169   :  { %2491 = vmatpush2.bf16.msra.mxu1 %v3699_v6  ;;  %v2087_v6 = vld [vmem:[%s4040_s4] sm:$0x3] }
 0x16a   :  { %v1803_v56 = vpop.f32.mrf.mxu0 }
 0x16b   :  { %v1844_v32 = vpop.f32.mrf.mxu1  ;;  %v1804_v53 = vadd.f32 %v1803_v56, %v1763_v55 }
 0x16c   :  { %v1805_v57 = vpop.f32.mrf.mxu0 }
 0x16d   :  { %v1846_v49 = vpop.f32.mrf.mxu1  ;;  %v1845_v60 = vadd.f32 %v1844_v32, %v1804_v53  ;;  %v1806_v61 = vadd.f32 %v1805_v57, %v1765_v58 }
 0x16e   :  { %v1807_v63 = vpop.f32.mrf.mxu0 }
 0x16f   :  { %v1848_v48 = vpop.f32.mrf.mxu1  ;;  %v1847_v0 = vadd.f32 %v1846_v49, %v1806_v61  ;;  %v2015_v46 = vmax.f32 %v1845_v60, 0.0  ;;  %v3714_v49 = vld [vmem:[%s4041_s5 + $0x48] sm:$0xff]   ;;  %v3717_v63 = vld [vmem:[%s4041_s5] sm:$0xff]  }
 0x170   :  { %v1808_v1 = vpop.f32.mrf.mxu0 }
 0x171   :  { %v1849_v2 = vpop.f32.mrf.mxu1  ;;  %v2016_v5 = vmax.f32 %v1847_v0, 0.0  ;;  %v2019_v7 = vpack.c.bf16 %v2015_v46, %v2015_v46  ;;  %v3718_v0 = vld [vmem:[#allocation7 + $0x38] sm:$0xff]   ;;  %v3822_v46 = vmov 0.0   ;;  %v3719_v1 = vld [vmem:[#allocation7 + $0x30] sm:$0xff]  }
 0x172   :  { %3187 = vmatprep.subr.bf16.mxu1 %v3822_v46  ;;  %v3720_v2 = vld [vmem:[#allocation7 + $0x28] sm:$0xff]  }
 0x173   :  { %v2020_v50 = vpack.c.bf16 %v2016_v5, %v2016_v5  ;;  %v3722_v5 = vld [vmem:[#allocation7 + $0x18] sm:$0xff]  }
 0x175   :  { %2451 = vmatprep.mubr.bf16.mxu0 %v2020_v50  ;;  %v2092_v50 = vrot.slane %v2087_v6, %v389_v40  ;;  %v3724_v40 = vld [vmem:[#allocation7 + $0x8] sm:$0xff]  }
 0x176   :  { %2452 = vmatmul.mubr.bf16.vlgmr.msra.gmra.mxu0 %v2019_v7  ;;  %v2096_v7 = vrot.slane %v2087_v6, %v393_v42 }
 0x177   :  { %3157 = vmatpush3.bf16.msra.mxu0 %v3703_v19 }
 0x178   :  { %3158 = vmatprep.subr.bf16.mxu0 %v3704_v20 }
 0x17b   :  { %3159 = vmatpush3.bf16.msra.mxu0 %v3705_v21 }
 0x17c   :  { %3160 = vmatprep.subr.bf16.mxu0 %v3706_v22  ;;  %v3723_v22 = vld [vmem:[#allocation7 + $0x10] sm:$0xff]  }
 0x17f   :  { %3161 = vmatpush3.bf16.msra.mxu0 %v3707_v23  ;;  %v3130_v23 = vld [vmem:[%s4042_s6] ss:$0 sm:$0xff]  ;;  %s3786_s6 = scalar_lea.vmem %s2801_s21, 32 }
 0x180   :  { %3162 = vmatprep.subr.bf16.mxu0 %v3708_v24  ;;  %p3787_p1 = scmp.ne.s32.totalorder %s2801_s21, %s3786_s6  ;;  %p3792_p3 = scmp.lt.s32.totalorder %s3786_s6, %s3786_s6 }
 0x182   :  { %p3793_p4 = por %p3792_p3, %p3791_p2 }
 0x183   :  { %3163 = vmatpush3.bf16.msra.mxu0 %v3709_v25 }
 0x184   :  { %3164 = vmatprep.subr.bf16.mxu0 %v3710_v26  ;;  %p3794_p5 = pnand %p3793_p4, %p3787_p1 }
 0x187   :  { %3165 = vmatpush3.bf16.msra.mxu0 %v3711_v27 }
 0x188   :  { %3166 = vmatprep.subr.bf16.mxu0 %v3712_v28 }
 0x18b   :  { %3167 = vmatpush3.bf16.msra.mxu0 %v3713_v29 }
 0x18c   :  { %3168 = vmatprep.subr.bf16.mxu0 %v3714_v49 }
 0x18f   :  { %3169 = vmatpush3.bf16.msra.mxu0 %v3715_v59 }
 0x190   :  { %3170 = vmatprep.subr.bf16.mxu0 %v3716_v45 }
 0x193   :  { %3171 = vmatpush3.bf16.msra.mxu0 %v3717_v63 }
 0x1aa   :  { %v1885_v8 = vpop.f32.mrf.mxu0 }
 0x1ab   :  { %v1926_v9 = vpop.f32.mrf.mxu1  ;;  %v1886_v36 = vadd.f32 %v1885_v8, %v398_v34 }
 0x1ac   :  { %v1887_v10 = vpop.f32.mrf.mxu0 }
 0x1ad   :  { %v1928_v11 = vpop.f32.mrf.mxu1  ;;  %v1888_v37 = vadd.f32 %v1887_v10, %v402_v35  ;;  %v1927_v38 = vadd.f32 %v1926_v9, %v1886_v36 }
 0x1ae   :  { %v1889_v12 = vpop.f32.mrf.mxu0 }
 0x1af   :  { %v1930_v13 = vpop.f32.mrf.mxu1  ;;  %v1929_v47 = vadd.f32 %v1928_v11, %v1888_v37 }
 0x1b0   :  { %v1890_v14 = vpop.f32.mrf.mxu0 }
 0x1b1   :  { %v1931_v15 = vpop.f32.mrf.mxu1 }
 0x1ea   :  { %v1967_v39 = vpop.f32.mrf.mxu0 }
 0x1eb   :  { %v2008_v44 = vpop.f32.mrf.mxu1  ;;  %v1968_v62 = vadd.f32 %v1967_v39, %v1927_v38 }
 0x1ec   :  { %v1969_v3 = vpop.f32.mrf.mxu0 }
 0x1ed   :  { %v2010_v16 = vpop.f32.mrf.mxu1  ;;  %v2009_v51 = vadd.f32 %v2008_v44, %v1968_v62  ;;  %v1970_v17 = vadd.f32 %v1969_v3, %v1929_v47 }
 0x1ee   :  { %v1971_v52 = vpop.f32.mrf.mxu0 }
 0x1ef   :  { %v2012_v54 = vpop.f32.mrf.mxu1  ;;  %v2011_v55 = vadd.f32 %v2010_v16, %v1970_v17  ;;  %v2017_v31 = vmax.f32 %v2009_v51, 0.0 }
 0x1f0   :  { %v1972_v56 = vpop.f32.mrf.mxu0 }
 0x1f1   :  { %v2013_v32 = vpop.f32.mrf.mxu1  ;;  %v2018_v58 = vmax.f32 %v2011_v55, 0.0  ;;  %v2021_v41 = vpack.c.bf16 %v2017_v31, %v2017_v31 }
 0x1f3   :  { %v2022_v53 = vpack.c.bf16 %v2018_v58, %v2018_v58 }
 0x1f5   :  { %2492 = vmatprep.mubr.bf16.mxu1 %v2022_v53 }
 0x1f6   :  { %2493 = vmatmul.mubr.bf16.vlgmr.msra.gmra.mxu1 %v2021_v41 }
 0x1f7   :  { %3188 = vmatpush3.bf16.msra.mxu1 %v3718_v0  ;;  %3203 = vmatprep.mubr.msk.bf16.mxu1 %vm3823_vm0, %v3822_v46 }
 0x1f8   :  { %3189 = vmatprep.subr.bf16.mxu1 %v3822_v46 }
 0x1fb   :  { %3190 = vmatpush3.bf16.msra.mxu1 %v3719_v1 }
 0x1fc   :  { %3191 = vmatprep.subr.bf16.mxu1 %v3822_v46 }
 0x1ff   :  { %3192 = vmatpush3.bf16.msra.mxu1 %v3720_v2 }
 0x200   :  { %3193 = vmatprep.subr.bf16.mxu1 %v3822_v46 }
 0x203   :  { %3194 = vmatpush3.bf16.msra.mxu1 %v3721_v4 }
 0x204   :  { %3195 = vmatprep.subr.bf16.mxu1 %v3822_v46 }
 0x207   :  { %3196 = vmatpush3.bf16.msra.mxu1 %v3722_v5 }
 0x208   :  { %3197 = vmatprep.subr.bf16.mxu1 %v3822_v46 }
 0x20b   :  { %3198 = vmatpush3.bf16.msra.mxu1 %v3723_v22 }
 0x20c   :  { %3199 = vmatprep.subr.bf16.mxu1 %v3822_v46 }
 0x20f   :  { %3200 = vmatpush3.bf16.msra.mxu1 %v3724_v40 }
 0x210   :  { %3201 = vmatprep.subr.bf16.mxu1 %v3822_v46 }
 0x213   :  { %3202 = vmatpush3.bf16.msra.mxu1 %v3725_v43 }
 0x236   :  { %v2453_v57 = vpop.f32.mrf.mxu0 }
 0x237   :  { %v2454_v8 = vadd.f32 %v2453_v57, %v2092_v50 }
 0x238   :  { %v2455_v60 = vpop.f32.mrf.mxu0 }
 0x239   :  { %v2456_v10 = vadd.f32 %v2455_v60, %v2096_v7 }
 0x23a   :  { %v2457_v61 = vpop.f32.mrf.mxu0 }
 0x23c   :  { %v2458_v48 = vpop.f32.mrf.mxu0 }
 0x2b6   :  { %v2494_v9 = vpop.f32.mrf.mxu1 }
 0x2b7   :  { %v2495_v11 = vadd.f32 %v2494_v9, %v2454_v8 }
 0x2b8   :  { %v2496_v12 = vpop.f32.mrf.mxu1 }
 0x2b9   :  { %v2497_v13 = vadd.f32 %v2496_v12, %v2456_v10  ;;  %v2501_v14 = vmax.f32 %v2495_v11, 0.0 }
 0x2ba   :  { %v2498_v15 = vpop.f32.mrf.mxu1 }
 0x2bb   :  { %v2502_v18 = vmax.f32 %v2497_v13, 0.0  ;;  %v2503_v21 = vpack.c.bf16 %v2501_v14, %v2501_v14 }
 0x2bc   :  { %v2499_v19 = vpop.f32.mrf.mxu1 }
 0x2bd   :  { %v2504_v20 = vpack.c.bf16 %v2502_v18, %v2502_v18 }
 0x2bf   :  { %2672 = vmatprep.mubr.bf16.mxu0 %v2504_v20 }
 0x2c0   :  { %2673 = vmatmul.mubr.bf16.vlgmr.msra.gmra.mxu0 %v2503_v21 }
 0x380   :  { %v3172_v42 = vpop.f32.mrf.mxu0 }
 0x382   :  { %v3173_v24 = vpop.f32.mrf.mxu0 }
 0x383   :  { %v3174_v25 = vadd.f32 %v3173_v24, %v3172_v42 }
 0x384   :  { %v3175_v26 = vpop.f32.mrf.mxu0 }
 0x385   :  { %v2675_v27 = vadd.f32 %v3174_v25, %v3130_v23 }
 0x386   :  { %v3176_v28 = vpop.f32.mrf.mxu0 }
 0x387   :  { %v2680_v29 = vmax.f32 %v2675_v27, 0.0 }
 0x389   :  { %v2681_v30 = vpack.c.bf16 %v2680_v29, %v2680_v29 }
 0x38b   :  { %3204 = vmatmul.mubr.bf16.vlgmr.msra.gmra.mxu1 %v2681_v30 }
 0x44b   :  { %v2787_v34 = vpop.f32.mrf.mxu1 }
 0x44c   :  { %v2788_v35 = vadd.f32 %v3147_v33, %v2787_v34 }
 0x44d   :  { %v3205_v36 = vpop.f32.mrf.mxu1 }
 0x44e   :  { %2793 = vst [vmem:[#allocation8] sm:$0x3] %v2788_v35 }
 0x44f   :  { %v2790_v37 = vpop.f32.mrf.mxu1 }
 0x450   :  { %3797 = shalt.err (!%p3794_p5)
}
 0x451   :  { %2803 = dma.vmem_to_hbm [thread:$0]  %s2801_s21, 32, %s4045_s9, [#allocation4]   ;;  %v3206_v38 = vpop.f32.mrf.mxu1 }
 0x452   :  { %3810 = dma.done.wait [#allocation4], 32  }
 0x453   :  { %3811 = vsyncadd [#allocation4], 4294967264 }
 0x454   :  { %2807 = vsyncpa [#allocation3], 1 }
 0x455   :  { %2808 = vsyncpa [#allocation6], 1 }
 0x456   :  { %2809 = vsyncpa [#allocation4], 1 }

</bundles_post_ra>
